<compile_context>
chip_gen: v5e
topology: v5e:2x2
jax: 0.10.0
libtpu: 0.0.40
codegen_flags: <defaults>
</compile_context>

<pallas_src>
import jax
import jax.numpy as jnp
from jax import lax
from jax.experimental import pallas as pl
from jax.experimental.pallas import tpu as pltpu

N = len('SUCTF{xxxxxxxxxxx?xxxxxxxxxxxxxxxxxxxxxxxxxxxxx}')  # 48
RSTRIDE = 128        # lane stride of one padded image row in the flat linear output
PAD_ROWS = 56        # sublane-aligned height of the zero-padded (50,50) image scratch


def _net_fused_kernel(x_ref, w1c_ref, wt_ref, bl_ref, sh_ref, w2b2_ref,
                      o_ref, pad_ref):
    # x_ref   : (1, 1, 9N)        one flattened input (row-major view of (3, 3N))
    # w1c_ref : (9N, N)           conv1 folded into a matmul operand (grid-constant)
    # wt_ref  : (N, N*128)        linear weight, transposed + 128-lane padded rows
    # bl_ref  : (1, N*128)        linear bias, row-padded, conv1 bias folded in
    # sh_ref  : (128, 128)        column-shift matrix: (p @ sh)[:, c] == p[:, c+1]
    # w2b2_ref: (8,)   SMEM       [w00, w01, w10, w11, b2, 0, 0, 0]
    # o_ref   : (1, N+1, 128)     lane-dense output block (cols >= N+1 discarded)
    # pad_ref : (56, 128)  VMEM   zero-padded (50,50) image lives at [0:50, 0:50]

    # --- stage 1: conv1 (3x3, stride 3) as one matmul (bias folded into bl) ----
    v = jnp.dot(x_ref[0], w1c_ref[...], preferred_element_type=jnp.float32)   # (1, N)

    # --- stage 2: linear -> flat padded image rows, lane stride 128 ------------
    # yflat[0, i*128 + c] = 0 for c == 0 or c > N, else y2[i, c-1]
    yflat = jnp.dot(v, wt_ref[...], preferred_element_type=jnp.float32) + bl_ref[...]

    # --- stage 3: scatter rows into the zero-padded image (aligned segments) ---
    pad_ref[...] = jnp.zeros_like(pad_ref)
    for i in range(N):  # static, unrolled: each source slice starts on a vreg boundary
        pad_ref[i + 1:i + 2, :] = yflat[:, i * RSTRIDE:(i + 1) * RSTRIDE]

    # --- stage 4: 2x2 conv, stride 1, padding 1 -> lane-dense (N+1, 128) -------
    p = pad_ref[...]                                                  # (56, 128)
    pr = jnp.dot(p, sh_ref[...], preferred_element_type=jnp.float32)  # pr[:, c] = p[:, c+1]
    w00 = w2b2_ref[0]
    w01 = w2b2_ref[1]
    w10 = w2b2_ref[2]
    w11 = w2b2_ref[3]
    b2 = w2b2_ref[4]
    o_ref[0] = (w00 * p[0:N + 1, :] + w01 * pr[0:N + 1, :]
                + w10 * p[1:N + 2, :] + w11 * pr[1:N + 2, :] + b2)


def prepare_params(params):
    """One-time parameter preparation (fold / transpose / pad).  Not per-call."""
    w_conv1, b_conv1, w_lin, b_lin, w_conv, b_conv = params
    f32 = jnp.float32

    # conv1 folded into a (9N, N) matmul operand:
    #   w1comb[ki*3N + c, j] = w_conv1[ki, c-3j] if 0 <= c-3j < 3 else 0
    w1 = w_conv1.reshape(3, 3).astype(f32)
    c = jnp.arange(3 * N)[:, None]
    j = jnp.arange(N)[None, :]
    kj = c - 3 * j
    valid = (kj >= 0) & (kj < 3)
    blocks = [jnp.where(valid, w1[ki][jnp.clip(kj, 0, 2)], 0.0) for ki in range(3)]
    w1comb = jnp.concatenate(blocks, axis=0)                               # (9N, N)

    # linear: transpose once; pad each image row to a 128-lane segment
    wt = jnp.transpose(w_lin.astype(f32))                                  # (N, N*N)
    wt3 = wt.reshape(N, N, N)                                              # [k, i, j]
    wt_pad = jnp.pad(wt3, ((0, 0), (0, 0), (1, RSTRIDE - N - 1))
                     ).reshape(N, N * RSTRIDE)                             # (N, N*128)
    bl_pad = jnp.pad(b_lin.astype(f32).reshape(N, N),
                     ((0, 0), (1, RSTRIDE - N - 1))).reshape(1, N * RSTRIDE)
    # fold conv1 bias:  (v_raw + b1) @ wt + bl  ==  v_raw @ wt + (b1*colsum(wt) + bl)
    b1 = b_conv1.astype(f32).reshape(())
    bl_comb = bl_pad + b1 * jnp.sum(wt_pad, axis=0, keepdims=True)         # (1, N*128)

    # column-shift matrix for the 2x2 conv: (p @ S)[:, c] = p[:, c+1]
    shift_m = jnp.eye(RSTRIDE, k=-1, dtype=f32)                            # (128, 128)

    # 2x2 conv weight + bias packed into a single SMEM operand
    w2b2 = jnp.concatenate([w_conv.reshape(4).astype(f32),
                            b_conv.reshape(1).astype(f32),
                            jnp.zeros((3,), f32)])                         # (8,)

    return (w1comb, wt_pad, bl_comb, shift_m, w2b2)


def net_forward_batch(xb, prepared):
    """Run B independent `Net.forward` evaluations in one pallas_call.

    xb: (B, ...) where each batch element has 9*N elements (the module's
    x.view(1,1,3,3n) accepts any such x).  Returns (B, 1, 1, N+1, N+1).
    """
    w1comb, wt_pad, bl_comb, shift_m, w2b2 = prepared
    B = xb.shape[0]
    x3 = xb.reshape(B, 1, 9 * N).astype(jnp.float32)   # row-major flat view per element

    smem = pltpu.MemorySpace.SMEM
    out = pl.pallas_call(
        _net_fused_kernel,
        out_shape=jax.ShapeDtypeStruct((B, N + 1, 128), jnp.float32),
        grid=(B,),
        in_specs=[
            pl.BlockSpec((1, 1, 9 * N), lambda b: (b, 0, 0)),              # x (per step)
            pl.BlockSpec((9 * N, N), lambda b: (0, 0)),                    # w1comb (resident)
            pl.BlockSpec((N, N * RSTRIDE), lambda b: (0, 0)),              # wt_pad (resident)
            pl.BlockSpec((1, N * RSTRIDE), lambda b: (0, 0)),              # bl_comb (resident)
            pl.BlockSpec((RSTRIDE, RSTRIDE), lambda b: (0, 0)),            # shift matrix
            pl.BlockSpec((8,), lambda b: (0,), memory_space=smem),         # w2 + b2
        ],
        out_specs=pl.BlockSpec((1, N + 1, 128), lambda b: (b, 0, 0)),
        scratch_shapes=[
            pltpu.VMEM((PAD_ROWS, 128), jnp.float32),   # zero-padded (50,50) image
        ],
        compiler_params=pltpu.CompilerParams(dimension_semantics=("parallel",)),
    )(x3, w1comb, wt_pad, bl_comb, shift_m, w2b2)

    # Drop the lane padding (cols >= N+1) and restore the module's output shape.
    return out[:, :, :N + 1].reshape(B, 1, 1, N + 1, N + 1)


def net_forward(x, prepared):
    """Single forward matching Net.forward(x) -> (1, 1, N+1, N+1)."""
    return net_forward_batch(x.reshape(1, -1), prepared)[0]


def net_reference(x, params):
    """Pure-JAX reference with identical semantics (for verification)."""
    w_conv1, b_conv1, w_lin, b_lin, w_conv, b_conv = params
    hi = lax.Precision.HIGHEST
    x2 = x.reshape(3, 3 * N)
    a = x2.reshape(3, N, 3)                                    # [ki, j, kj]
    v = jnp.einsum('kjl,kl->j', a, w_conv1.reshape(3, 3), precision=hi) + b_conv1
    y = jnp.dot(w_lin, v, precision=hi) + b_lin
    y2 = y.reshape(N, N)
    yp = jnp.pad(y2, 1)
    w2 = w_conv.reshape(2, 2)
    out = (w2[0, 0] * yp[0:N + 1, 0:N + 1]
           + w2[0, 1] * yp[0:N + 1, 1:N + 2]
           + w2[1, 0] * yp[1:N + 2, 0:N + 1]
           + w2[1, 1] * yp[1:N + 2, 1:N + 2]
           + b_conv[0])
    return out.reshape(1, 1, N + 1, N + 1)


if __name__ == "__main__":
    key = jax.random.PRNGKey(0)
    ks = jax.random.split(key, 7)

    # Batch of inputs, each consistent with x.view(1, 1, 3, 3*n): 9*n = 432 elems.
    B = 4
    xb = jax.random.normal(ks[0], (B, 1, 1, 3, 3 * N), dtype=jnp.float32)

    # Deterministic synthetic parameters with the nn.Module's shapes.
    params = (
        jax.random.normal(ks[1], (1, 1, 3, 3), dtype=jnp.float32) * 0.5,    # conv1.weight
        jax.random.normal(ks[2], (1,), dtype=jnp.float32) * 0.1,            # conv1.bias
        jax.random.normal(ks[3], (N * N, N), dtype=jnp.float32)
        / jnp.sqrt(N).astype(jnp.float32),                                  # linear.weight
        jax.random.normal(ks[4], (N * N,), dtype=jnp.float32) * 0.1,        # linear.bias
        jax.random.normal(ks[5], (1, 1, 2, 2), dtype=jnp.float32) * 0.5,    # conv.weight
        jax.random.normal(ks[6], (1,), dtype=jnp.float32) * 0.1,            # conv.bias
    )

    prepared = prepare_params(params)          # one-time weight fold/transpose/pad
    fwd_batch = jax.jit(net_forward_batch)
    fwd_one = jax.jit(net_forward)

    # Batched path: B forwards in one pallas_call, weight resident across the grid.
    outb = jax.block_until_ready(fwd_batch(xb, prepared))
    if outb.shape != (B, 1, 1, N + 1, N + 1):
        raise AssertionError(f"bad output shape {outb.shape}")
    for i in range(B):
        ref = net_reference(xb[i], params)
        err = float(jnp.max(jnp.abs(outb[i] - ref)))
        if not bool(jnp.allclose(outb[i], ref, rtol=2e-3, atol=2e-3)):
            raise AssertionError(f"batch element {i}: mismatch vs reference, max abs err={err}")

    # Single-forward path (module-equivalent signature).
    out1 = jax.block_until_ready(fwd_one(xb[0], prepared))
    ref1 = net_reference(xb[0], params)
    if out1.shape != (1, 1, N + 1, N + 1):
        raise AssertionError(f"bad single-forward shape {out1.shape}")
    if not bool(jnp.allclose(out1, ref1, rtol=2e-3, atol=2e-3)):
        raise AssertionError(
            f"single forward mismatch, max abs err={float(jnp.max(jnp.abs(out1 - ref1)))}")

    print("KERNEL_OK")
</pallas_src>

<mosaic_0001>
module attributes {stable_mosaic.version = 11 : i64} {
  func.func @_net_fused_kernel(%arg0: i32, %arg1: memref<1x1x432xf32, #tpu.memory_space<vmem>>, %arg2: memref<432x48xf32, #tpu.memory_space<vmem>>, %arg3: memref<48x6144xf32, #tpu.memory_space<vmem>>, %arg4: memref<1x6144xf32, #tpu.memory_space<vmem>>, %arg5: memref<128x128xf32, #tpu.memory_space<vmem>>, %arg6: memref<8xf32, #tpu.memory_space<smem>>, %arg7: memref<1x49x128xf32, #tpu.memory_space<vmem>>, %arg8: memref<56x128xf32, #tpu.memory_space<vmem>>) attributes {dimension_semantics = [#tpu.dimension_semantics<parallel>], iteration_bounds = array<i64: 4>, scalar_prefetch = 0 : i64, scratch_operands = 1 : i64, tpu.core_type = #tpu.core_type<tc>, window_params = [{transform_indices = @transform_0, window_bounds = array<i64: 1, 1, 432>}, {pipeline_mode = #tpu.pipeline_mode<synchronous>, transform_indices = @transform_1, window_bounds = array<i64: 432, 48>}, {pipeline_mode = #tpu.pipeline_mode<synchronous>, transform_indices = @transform_2, window_bounds = array<i64: 48, 6144>}, {pipeline_mode = #tpu.pipeline_mode<synchronous>, transform_indices = @transform_3, window_bounds = array<i64: 1, 6144>}, {pipeline_mode = #tpu.pipeline_mode<synchronous>, transform_indices = @transform_4, window_bounds = array<i64: 128, 128>}, {transform_indices = @transform_5, window_bounds = array<i64: 8>}, {transform_indices = @transform_6, window_bounds = array<i64: 1, 49, 128>}]} {
    %c0 = arith.constant 0 : index
    %c0_0 = arith.constant 0 : index
    %c0_1 = arith.constant 0 : index
    %0 = vector.load %arg1[%c0, %c0_0, %c0_1] : memref<1x1x432xf32, #tpu.memory_space<vmem>>, vector<1x1x432xf32>
    %1 = vector.shape_cast %0 : vector<1x1x432xf32> to vector<1x432xf32>
    %c0_2 = arith.constant 0 : index
    %c0_3 = arith.constant 0 : index
    %2 = vector.load %arg2[%c0_2, %c0_3] : memref<432x48xf32, #tpu.memory_space<vmem>>, vector<432x48xf32>
    %cst = arith.constant dense<0.000000e+00> : vector<1x48xf32>
    %3 = tpu.matmul %1, %2, %cst {dimension_numbers = #tpu.dot_dimension_numbers<[1], [0], [0], [1], [0, 0, 1, 1], [], []>} : vector<1x432xf32>, vector<432x48xf32>, vector<1x48xf32> -> vector<1x48xf32>
    %c0_4 = arith.constant 0 : index
    %c0_5 = arith.constant 0 : index
    %4 = vector.load %arg3[%c0_4, %c0_5] : memref<48x6144xf32, #tpu.memory_space<vmem>>, vector<48x6144xf32>
    %cst_6 = arith.constant dense<0.000000e+00> : vector<1x6144xf32>
    %5 = tpu.matmul %3, %4, %cst_6 {dimension_numbers = #tpu.dot_dimension_numbers<[1], [0], [0], [1], [0, 0, 1, 1], [], []>} : vector<1x48xf32>, vector<48x6144xf32>, vector<1x6144xf32> -> vector<1x6144xf32>
    %c0_7 = arith.constant 0 : index
    %c0_8 = arith.constant 0 : index
    %6 = vector.load %arg4[%c0_7, %c0_8] : memref<1x6144xf32, #tpu.memory_space<vmem>>, vector<1x6144xf32>
    %7 = arith.addf %5, %6 : vector<1x6144xf32>
    %cst_9 = arith.constant 0.000000e+00 : f32
    %8 = vector.broadcast %cst_9 : f32 to vector<56x128xf32>
    %c0_10 = arith.constant 0 : index
    %c0_11 = arith.constant 0 : index
    %9 = vector.load %arg8[%c0_10, %c0_11] : memref<56x128xf32, #tpu.memory_space<vmem>>, vector<56x128xf32>
    tpu.vector_store %arg8[%c0_10, %c0_11], %8 {strides = array<i32>} : memref<56x128xf32, #tpu.memory_space<vmem>>, vector<56x128xf32>,
    %10 = vector.extract_strided_slice %7 {offsets = [0, 0], sizes = [1, 128], strides = [1, 1]} : vector<1x6144xf32> to vector<1x128xf32>
    %c1 = arith.constant 1 : index
    %c0_12 = arith.constant 0 : index
    %11 = vector.load %arg8[%c1, %c0_12] : memref<56x128xf32, #tpu.memory_space<vmem>>, vector<1x128xf32>
    tpu.vector_store %arg8[%c1, %c0_12], %10 {strides = array<i32>} : memref<56x128xf32, #tpu.memory_space<vmem>>, vector<1x128xf32>,
    %12 = vector.extract_strided_slice %7 {offsets = [0, 128], sizes = [1, 128], strides = [1, 1]} : vector<1x6144xf32> to vector<1x128xf32>
    %c2 = arith.constant 2 : index
    %c0_13 = arith.constant 0 : index
    %13 = vector.load %arg8[%c2, %c0_13] : memref<56x128xf32, #tpu.memory_space<vmem>>, vector<1x128xf32>
    tpu.vector_store %arg8[%c2, %c0_13], %12 {strides = array<i32>} : memref<56x128xf32, #tpu.memory_space<vmem>>, vector<1x128xf32>,
    %14 = vector.extract_strided_slice %7 {offsets = [0, 256], sizes = [1, 128], strides = [1, 1]} : vector<1x6144xf32> to vector<1x128xf32>
    %c3 = arith.constant 3 : index
    %c0_14 = arith.constant 0 : index
    %15 = vector.load %arg8[%c3, %c0_14] : memref<56x128xf32, #tpu.memory_space<vmem>>, vector<1x128xf32>
    tpu.vector_store %arg8[%c3, %c0_14], %14 {strides = array<i32>} : memref<56x128xf32, #tpu.memory_space<vmem>>, vector<1x128xf32>,
    %16 = vector.extract_strided_slice %7 {offsets = [0, 384], sizes = [1, 128], strides = [1, 1]} : vector<1x6144xf32> to vector<1x128xf32>
    %c4 = arith.constant 4 : index
    %c0_15 = arith.constant 0 : index
    %17 = vector.load %arg8[%c4, %c0_15] : memref<56x128xf32, #tpu.memory_space<vmem>>, vector<1x128xf32>
    tpu.vector_store %arg8[%c4, %c0_15], %16 {strides = array<i32>} : memref<56x128xf32, #tpu.memory_space<vmem>>, vector<1x128xf32>,
    %18 = vector.extract_strided_slice %7 {offsets = [0, 512], sizes = [1, 128], strides = [1, 1]} : vector<1x6144xf32> to vector<1x128xf32>
    %c5 = arith.constant 5 : index
    %c0_16 = arith.constant 0 : index
    %19 = vector.load %arg8[%c5, %c0_16] : memref<56x128xf32, #tpu.memory_space<vmem>>, vector<1x128xf32>
    tpu.vector_store %arg8[%c5, %c0_16], %18 {strides = array<i32>} : memref<56x128xf32, #tpu.memory_space<vmem>>, vector<1x128xf32>,
    %20 = vector.extract_strided_slice %7 {offsets = [0, 640], sizes = [1, 128], strides = [1, 1]} : vector<1x6144xf32> to vector<1x128xf32>
    %c6 = arith.constant 6 : index
    %c0_17 = arith.constant 0 : index
    %21 = vector.load %arg8[%c6, %c0_17] : memref<56x128xf32, #tpu.memory_space<vmem>>, vector<1x128xf32>
    tpu.vector_store %arg8[%c6, %c0_17], %20 {strides = array<i32>} : memref<56x128xf32, #tpu.memory_space<vmem>>, vector<1x128xf32>,
    %22 = vector.extract_strided_slice %7 {offsets = [0, 768], sizes = [1, 128], strides = [1, 1]} : vector<1x6144xf32> to vector<1x128xf32>
    %c7 = arith.constant 7 : index
    %c0_18 = arith.constant 0 : index
    %23 = vector.load %arg8[%c7, %c0_18] : memref<56x128xf32, #tpu.memory_space<vmem>>, vector<1x128xf32>
    tpu.vector_store %arg8[%c7, %c0_18], %22 {strides = array<i32>} : memref<56x128xf32, #tpu.memory_space<vmem>>, vector<1x128xf32>,
    %24 = vector.extract_strided_slice %7 {offsets = [0, 896], sizes = [1, 128], strides = [1, 1]} : vector<1x6144xf32> to vector<1x128xf32>
    %c8 = arith.constant 8 : index
    %c0_19 = arith.constant 0 : index
    %25 = vector.load %arg8[%c8, %c0_19] : memref<56x128xf32, #tpu.memory_space<vmem>>, vector<1x128xf32>
    tpu.vector_store %arg8[%c8, %c0_19], %24 {strides = array<i32>} : memref<56x128xf32, #tpu.memory_space<vmem>>, vector<1x128xf32>,
    %26 = vector.extract_strided_slice %7 {offsets = [0, 1024], sizes = [1, 128], strides = [1, 1]} : vector<1x6144xf32> to vector<1x128xf32>
    %c9 = arith.constant 9 : index
    %c0_20 = arith.constant 0 : index
    %27 = vector.load %arg8[%c9, %c0_20] : memref<56x128xf32, #tpu.memory_space<vmem>>, vector<1x128xf32>
    tpu.vector_store %arg8[%c9, %c0_20], %26 {strides = array<i32>} : memref<56x128xf32, #tpu.memory_space<vmem>>, vector<1x128xf32>,
    %28 = vector.extract_strided_slice %7 {offsets = [0, 1152], sizes = [1, 128], strides = [1, 1]} : vector<1x6144xf32> to vector<1x128xf32>
    %c10 = arith.constant 10 : index
    %c0_21 = arith.constant 0 : index
    %29 = vector.load %arg8[%c10, %c0_21] : memref<56x128xf32, #tpu.memory_space<vmem>>, vector<1x128xf32>
    tpu.vector_store %arg8[%c10, %c0_21], %28 {strides = array<i32>} : memref<56x128xf32, #tpu.memory_space<vmem>>, vector<1x128xf32>,
    %30 = vector.extract_strided_slice %7 {offsets = [0, 1280], sizes = [1, 128], strides = [1, 1]} : vector<1x6144xf32> to vector<1x128xf32>
    %c11 = arith.constant 11 : index
    %c0_22 = arith.constant 0 : index
    %31 = vector.load %arg8[%c11, %c0_22] : memref<56x128xf32, #tpu.memory_space<vmem>>, vector<1x128xf32>
    tpu.vector_store %arg8[%c11, %c0_22], %30 {strides = array<i32>} : memref<56x128xf32, #tpu.memory_space<vmem>>, vector<1x128xf32>,
    %32 = vector.extract_strided_slice %7 {offsets = [0, 1408], sizes = [1, 128], strides = [1, 1]} : vector<1x6144xf32> to vector<1x128xf32>
    %c12 = arith.constant 12 : index
    %c0_23 = arith.constant 0 : index
    %33 = vector.load %arg8[%c12, %c0_23] : memref<56x128xf32, #tpu.memory_space<vmem>>, vector<1x128xf32>
    tpu.vector_store %arg8[%c12, %c0_23], %32 {strides = array<i32>} : memref<56x128xf32, #tpu.memory_space<vmem>>, vector<1x128xf32>,
    %34 = vector.extract_strided_slice %7 {offsets = [0, 1536], sizes = [1, 128], strides = [1, 1]} : vector<1x6144xf32> to vector<1x128xf32>
    %c13 = arith.constant 13 : index
    %c0_24 = arith.constant 0 : index
    %35 = vector.load %arg8[%c13, %c0_24] : memref<56x128xf32, #tpu.memory_space<vmem>>, vector<1x128xf32>
    tpu.vector_store %arg8[%c13, %c0_24], %34 {strides = array<i32>} : memref<56x128xf32, #tpu.memory_space<vmem>>, vector<1x128xf32>,
    %36 = vector.extract_strided_slice %7 {offsets = [0, 1664], sizes = [1, 128], strides = [1, 1]} : vector<1x6144xf32> to vector<1x128xf32>
    %c14 = arith.constant 14 : index
    %c0_25 = arith.constant 0 : index
    %37 = vector.load %arg8[%c14, %c0_25] : memref<56x128xf32, #tpu.memory_space<vmem>>, vector<1x128xf32>
    tpu.vector_store %arg8[%c14, %c0_25], %36 {strides = array<i32>} : memref<56x128xf32, #tpu.memory_space<vmem>>, vector<1x128xf32>,
    %38 = vector.extract_strided_slice %7 {offsets = [0, 1792], sizes = [1, 128], strides = [1, 1]} : vector<1x6144xf32> to vector<1x128xf32>
    %c15 = arith.constant 15 : index
    %c0_26 = arith.constant 0 : index
    %39 = vector.load %arg8[%c15, %c0_26] : memref<56x128xf32, #tpu.memory_space<vmem>>, vector<1x128xf32>
    tpu.vector_store %arg8[%c15, %c0_26], %38 {strides = array<i32>} : memref<56x128xf32, #tpu.memory_space<vmem>>, vector<1x128xf32>,
    %40 = vector.extract_strided_slice %7 {offsets = [0, 1920], sizes = [1, 128], strides = [1, 1]} : vector<1x6144xf32> to vector<1x128xf32>
    %c16 = arith.constant 16 : index
    %c0_27 = arith.constant 0 : index
    %41 = vector.load %arg8[%c16, %c0_27] : memref<56x128xf32, #tpu.memory_space<vmem>>, vector<1x128xf32>
    tpu.vector_store %arg8[%c16, %c0_27], %40 {strides = array<i32>} : memref<56x128xf32, #tpu.memory_space<vmem>>, vector<1x128xf32>,
    %42 = vector.extract_strided_slice %7 {offsets = [0, 2048], sizes = [1, 128], strides = [1, 1]} : vector<1x6144xf32> to vector<1x128xf32>
    %c17 = arith.constant 17 : index
    %c0_28 = arith.constant 0 : index
    %43 = vector.load %arg8[%c17, %c0_28] : memref<56x128xf32, #tpu.memory_space<vmem>>, vector<1x128xf32>
    tpu.vector_store %arg8[%c17, %c0_28], %42 {strides = array<i32>} : memref<56x128xf32, #tpu.memory_space<vmem>>, vector<1x128xf32>,
    %44 = vector.extract_strided_slice %7 {offsets = [0, 2176], sizes = [1, 128], strides = [1, 1]} : vector<1x6144xf32> to vector<1x128xf32>
    %c18 = arith.constant 18 : index
    %c0_29 = arith.constant 0 : index
    %45 = vector.load %arg8[%c18, %c0_29] : memref<56x128xf32, #tpu.memory_space<vmem>>, vector<1x128xf32>
    tpu.vector_store %arg8[%c18, %c0_29], %44 {strides = array<i32>} : memref<56x128xf32, #tpu.memory_space<vmem>>, vector<1x128xf32>,
    %46 = vector.extract_strided_slice %7 {offsets = [0, 2304], sizes = [1, 128], strides = [1, 1]} : vector<1x6144xf32> to vector<1x128xf32>
    %c19 = arith.constant 19 : index
    %c0_30 = arith.constant 0 : index
    %47 = vector.load %arg8[%c19, %c0_30] : memref<56x128xf32, #tpu.memory_space<vmem>>, vector<1x128xf32>
    tpu.vector_store %arg8[%c19, %c0_30], %46 {strides = array<i32>} : memref<56x128xf32, #tpu.memory_space<vmem>>, vector<1x128xf32>,
    %48 = vector.extract_strided_slice %7 {offsets = [0, 2432], sizes = [1, 128], strides = [1, 1]} : vector<1x6144xf32> to vector<1x128xf32>
    %c20 = arith.constant 20 : index
    %c0_31 = arith.constant 0 : index
    %49 = vector.load %arg8[%c20, %c0_31] : memref<56x128xf32, #tpu.memory_space<vmem>>, vector<1x128xf32>
    tpu.vector_store %arg8[%c20, %c0_31], %48 {strides = array<i32>} : memref<56x128xf32, #tpu.memory_space<vmem>>, vector<1x128xf32>,
    %50 = vector.extract_strided_slice %7 {offsets = [0, 2560], sizes = [1, 128], strides = [1, 1]} : vector<1x6144xf32> to vector<1x128xf32>
    %c21 = arith.constant 21 : index
    %c0_32 = arith.constant 0 : index
    %51 = vector.load %arg8[%c21, %c0_32] : memref<56x128xf32, #tpu.memory_space<vmem>>, vector<1x128xf32>
    tpu.vector_store %arg8[%c21, %c0_32], %50 {strides = array<i32>} : memref<56x128xf32, #tpu.memory_space<vmem>>, vector<1x128xf32>,
    %52 = vector.extract_strided_slice %7 {offsets = [0, 2688], sizes = [1, 128], strides = [1, 1]} : vector<1x6144xf32> to vector<1x128xf32>
    %c22 = arith.constant 22 : index
    %c0_33 = arith.constant 0 : index
    %53 = vector.load %arg8[%c22, %c0_33] : memref<56x128xf32, #tpu.memory_space<vmem>>, vector<1x128xf32>
    tpu.vector_store %arg8[%c22, %c0_33], %52 {strides = array<i32>} : memref<56x128xf32, #tpu.memory_space<vmem>>, vector<1x128xf32>,
    %54 = vector.extract_strided_slice %7 {offsets = [0, 2816], sizes = [1, 128], strides = [1, 1]} : vector<1x6144xf32> to vector<1x128xf32>
    %c23 = arith.constant 23 : index
    %c0_34 = arith.constant 0 : index
    %55 = vector.load %arg8[%c23, %c0_34] : memref<56x128xf32, #tpu.memory_space<vmem>>, vector<1x128xf32>
    tpu.vector_store %arg8[%c23, %c0_34], %54 {strides = array<i32>} : memref<56x128xf32, #tpu.memory_space<vmem>>, vector<1x128xf32>,
    %56 = vector.extract_strided_slice %7 {offsets = [0, 2944], sizes = [1, 128], strides = [1, 1]} : vector<1x6144xf32> to vector<1x128xf32>
    %c24 = arith.constant 24 : index
    %c0_35 = arith.constant 0 : index
    %57 = vector.load %arg8[%c24, %c0_35] : memref<56x128xf32, #tpu.memory_space<vmem>>, vector<1x128xf32>
    tpu.vector_store %arg8[%c24, %c0_35], %56 {strides = array<i32>} : memref<56x128xf32, #tpu.memory_space<vmem>>, vector<1x128xf32>,
    %58 = vector.extract_strided_slice %7 {offsets = [0, 3072], sizes = [1, 128], strides = [1, 1]} : vector<1x6144xf32> to vector<1x128xf32>
    %c25 = arith.constant 25 : index
    %c0_36 = arith.constant 0 : index
    %59 = vector.load %arg8[%c25, %c0_36] : memref<56x128xf32, #tpu.memory_space<vmem>>, vector<1x128xf32>
    tpu.vector_store %arg8[%c25, %c0_36], %58 {strides = array<i32>} : memref<56x128xf32, #tpu.memory_space<vmem>>, vector<1x128xf32>,
    %60 = vector.extract_strided_slice %7 {offsets = [0, 3200], sizes = [1, 128], strides = [1, 1]} : vector<1x6144xf32> to vector<1x128xf32>
    %c26 = arith.constant 26 : index
    %c0_37 = arith.constant 0 : index
    %61 = vector.load %arg8[%c26, %c0_37] : memref<56x128xf32, #tpu.memory_space<vmem>>, vector<1x128xf32>
    tpu.vector_store %arg8[%c26, %c0_37], %60 {strides = array<i32>} : memref<56x128xf32, #tpu.memory_space<vmem>>, vector<1x128xf32>,
    %62 = vector.extract_strided_slice %7 {offsets = [0, 3328], sizes = [1, 128], strides = [1, 1]} : vector<1x6144xf32> to vector<1x128xf32>
    %c27 = arith.constant 27 : index
    %c0_38 = arith.constant 0 : index
    %63 = vector.load %arg8[%c27, %c0_38] : memref<56x128xf32, #tpu.memory_space<vmem>>, vector<1x128xf32>
    tpu.vector_store %arg8[%c27, %c0_38], %62 {strides = array<i32>} : memref<56x128xf32, #tpu.memory_space<vmem>>, vector<1x128xf32>,
    %64 = vector.extract_strided_slice %7 {offsets = [0, 3456], sizes = [1, 128], strides = [1, 1]} : vector<1x6144xf32> to vector<1x128xf32>
    %c28 = arith.constant 28 : index
    %c0_39 = arith.constant 0 : index
    %65 = vector.load %arg8[%c28, %c0_39] : memref<56x128xf32, #tpu.memory_space<vmem>>, vector<1x128xf32>
    tpu.vector_store %arg8[%c28, %c0_39], %64 {strides = array<i32>} : memref<56x128xf32, #tpu.memory_space<vmem>>, vector<1x128xf32>,
    %66 = vector.extract_strided_slice %7 {offsets = [0, 3584], sizes = [1, 128], strides = [1, 1]} : vector<1x6144xf32> to vector<1x128xf32>
    %c29 = arith.constant 29 : index
    %c0_40 = arith.constant 0 : index
    %67 = vector.load %arg8[%c29, %c0_40] : memref<56x128xf32, #tpu.memory_space<vmem>>, vector<1x128xf32>
    tpu.vector_store %arg8[%c29, %c0_40], %66 {strides = array<i32>} : memref<56x128xf32, #tpu.memory_space<vmem>>, vector<1x128xf32>,
    %68 = vector.extract_strided_slice %7 {offsets = [0, 3712], sizes = [1, 128], strides = [1, 1]} : vector<1x6144xf32> to vector<1x128xf32>
    %c30 = arith.constant 30 : index
    %c0_41 = arith.constant 0 : index
    %69 = vector.load %arg8[%c30, %c0_41] : memref<56x128xf32, #tpu.memory_space<vmem>>, vector<1x128xf32>
    tpu.vector_store %arg8[%c30, %c0_41], %68 {strides = array<i32>} : memref<56x128xf32, #tpu.memory_space<vmem>>, vector<1x128xf32>,
    %70 = vector.extract_strided_slice %7 {offsets = [0, 3840], sizes = [1, 128], strides = [1, 1]} : vector<1x6144xf32> to vector<1x128xf32>
    %c31 = arith.constant 31 : index
    %c0_42 = arith.constant 0 : index
    %71 = vector.load %arg8[%c31, %c0_42] : memref<56x128xf32, #tpu.memory_space<vmem>>, vector<1x128xf32>
    tpu.vector_store %arg8[%c31, %c0_42], %70 {strides = array<i32>} : memref<56x128xf32, #tpu.memory_space<vmem>>, vector<1x128xf32>,
    %72 = vector.extract_strided_slice %7 {offsets = [0, 3968], sizes = [1, 128], strides = [1, 1]} : vector<1x6144xf32> to vector<1x128xf32>
    %c32 = arith.constant 32 : index
    %c0_43 = arith.constant 0 : index
    %73 = vector.load %arg8[%c32, %c0_43] : memref<56x128xf32, #tpu.memory_space<vmem>>, vector<1x128xf32>
    tpu.vector_store %arg8[%c32, %c0_43], %72 {strides = array<i32>} : memref<56x128xf32, #tpu.memory_space<vmem>>, vector<1x128xf32>,
    %74 = vector.extract_strided_slice %7 {offsets = [0, 4096], sizes = [1, 128], strides = [1, 1]} : vector<1x6144xf32> to vector<1x128xf32>
    %c33 = arith.constant 33 : index
    %c0_44 = arith.constant 0 : index
    %75 = vector.load %arg8[%c33, %c0_44] : memref<56x128xf32, #tpu.memory_space<vmem>>, vector<1x128xf32>
    tpu.vector_store %arg8[%c33, %c0_44], %74 {strides = array<i32>} : memref<56x128xf32, #tpu.memory_space<vmem>>, vector<1x128xf32>,
    %76 = vector.extract_strided_slice %7 {offsets = [0, 4224], sizes = [1, 128], strides = [1, 1]} : vector<1x6144xf32> to vector<1x128xf32>
    %c34 = arith.constant 34 : index
    %c0_45 = arith.constant 0 : index
    %77 = vector.load %arg8[%c34, %c0_45] : memref<56x128xf32, #tpu.memory_space<vmem>>, vector<1x128xf32>
    tpu.vector_store %arg8[%c34, %c0_45], %76 {strides = array<i32>} : memref<56x128xf32, #tpu.memory_space<vmem>>, vector<1x128xf32>,
    %78 = vector.extract_strided_slice %7 {offsets = [0, 4352], sizes = [1, 128], strides = [1, 1]} : vector<1x6144xf32> to vector<1x128xf32>
    %c35 = arith.constant 35 : index
    %c0_46 = arith.constant 0 : index
    %79 = vector.load %arg8[%c35, %c0_46] : memref<56x128xf32, #tpu.memory_space<vmem>>, vector<1x128xf32>
    tpu.vector_store %arg8[%c35, %c0_46], %78 {strides = array<i32>} : memref<56x128xf32, #tpu.memory_space<vmem>>, vector<1x128xf32>,
    %80 = vector.extract_strided_slice %7 {offsets = [0, 4480], sizes = [1, 128], strides = [1, 1]} : vector<1x6144xf32> to vector<1x128xf32>
    %c36 = arith.constant 36 : index
    %c0_47 = arith.constant 0 : index
    %81 = vector.load %arg8[%c36, %c0_47] : memref<56x128xf32, #tpu.memory_space<vmem>>, vector<1x128xf32>
    tpu.vector_store %arg8[%c36, %c0_47], %80 {strides = array<i32>} : memref<56x128xf32, #tpu.memory_space<vmem>>, vector<1x128xf32>,
    %82 = vector.extract_strided_slice %7 {offsets = [0, 4608], sizes = [1, 128], strides = [1, 1]} : vector<1x6144xf32> to vector<1x128xf32>
    %c37 = arith.constant 37 : index
    %c0_48 = arith.constant 0 : index
    %83 = vector.load %arg8[%c37, %c0_48] : memref<56x128xf32, #tpu.memory_space<vmem>>, vector<1x128xf32>
    tpu.vector_store %arg8[%c37, %c0_48], %82 {strides = array<i32>} : memref<56x128xf32, #tpu.memory_space<vmem>>, vector<1x128xf32>,
    %84 = vector.extract_strided_slice %7 {offsets = [0, 4736], sizes = [1, 128], strides = [1, 1]} : vector<1x6144xf32> to vector<1x128xf32>
    %c38 = arith.constant 38 : index
    %c0_49 = arith.constant 0 : index
    %85 = vector.load %arg8[%c38, %c0_49] : memref<56x128xf32, #tpu.memory_space<vmem>>, vector<1x128xf32>
    tpu.vector_store %arg8[%c38, %c0_49], %84 {strides = array<i32>} : memref<56x128xf32, #tpu.memory_space<vmem>>, vector<1x128xf32>,
    %86 = vector.extract_strided_slice %7 {offsets = [0, 4864], sizes = [1, 128], strides = [1, 1]} : vector<1x6144xf32> to vector<1x128xf32>
    %c39 = arith.constant 39 : index
    %c0_50 = arith.constant 0 : index
    %87 = vector.load %arg8[%c39, %c0_50] : memref<56x128xf32, #tpu.memory_space<vmem>>, vector<1x128xf32>
    tpu.vector_store %arg8[%c39, %c0_50], %86 {strides = array<i32>} : memref<56x128xf32, #tpu.memory_space<vmem>>, vector<1x128xf32>,
    %88 = vector.extract_strided_slice %7 {offsets = [0, 4992], sizes = [1, 128], strides = [1, 1]} : vector<1x6144xf32> to vector<1x128xf32>
    %c40 = arith.constant 40 : index
    %c0_51 = arith.constant 0 : index
    %89 = vector.load %arg8[%c40, %c0_51] : memref<56x128xf32, #tpu.memory_space<vmem>>, vector<1x128xf32>
    tpu.vector_store %arg8[%c40, %c0_51], %88 {strides = array<i32>} : memref<56x128xf32, #tpu.memory_space<vmem>>, vector<1x128xf32>,
    %90 = vector.extract_strided_slice %7 {offsets = [0, 5120], sizes = [1, 128], strides = [1, 1]} : vector<1x6144xf32> to vector<1x128xf32>
    %c41 = arith.constant 41 : index
    %c0_52 = arith.constant 0 : index
    %91 = vector.load %arg8[%c41, %c0_52] : memref<56x128xf32, #tpu.memory_space<vmem>>, vector<1x128xf32>
    tpu.vector_store %arg8[%c41, %c0_52], %90 {strides = array<i32>} : memref<56x128xf32, #tpu.memory_space<vmem>>, vector<1x128xf32>,
    %92 = vector.extract_strided_slice %7 {offsets = [0, 5248], sizes = [1, 128], strides = [1, 1]} : vector<1x6144xf32> to vector<1x128xf32>
    %c42 = arith.constant 42 : index
    %c0_53 = arith.constant 0 : index
    %93 = vector.load %arg8[%c42, %c0_53] : memref<56x128xf32, #tpu.memory_space<vmem>>, vector<1x128xf32>
    tpu.vector_store %arg8[%c42, %c0_53], %92 {strides = array<i32>} : memref<56x128xf32, #tpu.memory_space<vmem>>, vector<1x128xf32>,
    %94 = vector.extract_strided_slice %7 {offsets = [0, 5376], sizes = [1, 128], strides = [1, 1]} : vector<1x6144xf32> to vector<1x128xf32>
    %c43 = arith.constant 43 : index
    %c0_54 = arith.constant 0 : index
    %95 = vector.load %arg8[%c43, %c0_54] : memref<56x128xf32, #tpu.memory_space<vmem>>, vector<1x128xf32>
    tpu.vector_store %arg8[%c43, %c0_54], %94 {strides = array<i32>} : memref<56x128xf32, #tpu.memory_space<vmem>>, vector<1x128xf32>,
    %96 = vector.extract_strided_slice %7 {offsets = [0, 5504], sizes = [1, 128], strides = [1, 1]} : vector<1x6144xf32> to vector<1x128xf32>
    %c44 = arith.constant 44 : index
    %c0_55 = arith.constant 0 : index
    %97 = vector.load %arg8[%c44, %c0_55] : memref<56x128xf32, #tpu.memory_space<vmem>>, vector<1x128xf32>
    tpu.vector_store %arg8[%c44, %c0_55], %96 {strides = array<i32>} : memref<56x128xf32, #tpu.memory_space<vmem>>, vector<1x128xf32>,
    %98 = vector.extract_strided_slice %7 {offsets = [0, 5632], sizes = [1, 128], strides = [1, 1]} : vector<1x6144xf32> to vector<1x128xf32>
    %c45 = arith.constant 45 : index
    %c0_56 = arith.constant 0 : index
    %99 = vector.load %arg8[%c45, %c0_56] : memref<56x128xf32, #tpu.memory_space<vmem>>, vector<1x128xf32>
    tpu.vector_store %arg8[%c45, %c0_56], %98 {strides = array<i32>} : memref<56x128xf32, #tpu.memory_space<vmem>>, vector<1x128xf32>,
    %100 = vector.extract_strided_slice %7 {offsets = [0, 5760], sizes = [1, 128], strides = [1, 1]} : vector<1x6144xf32> to vector<1x128xf32>
    %c46 = arith.constant 46 : index
    %c0_57 = arith.constant 0 : index
    %101 = vector.load %arg8[%c46, %c0_57] : memref<56x128xf32, #tpu.memory_space<vmem>>, vector<1x128xf32>
    tpu.vector_store %arg8[%c46, %c0_57], %100 {strides = array<i32>} : memref<56x128xf32, #tpu.memory_space<vmem>>, vector<1x128xf32>,
    %102 = vector.extract_strided_slice %7 {offsets = [0, 5888], sizes = [1, 128], strides = [1, 1]} : vector<1x6144xf32> to vector<1x128xf32>
    %c47 = arith.constant 47 : index
    %c0_58 = arith.constant 0 : index
    %103 = vector.load %arg8[%c47, %c0_58] : memref<56x128xf32, #tpu.memory_space<vmem>>, vector<1x128xf32>
    tpu.vector_store %arg8[%c47, %c0_58], %102 {strides = array<i32>} : memref<56x128xf32, #tpu.memory_space<vmem>>, vector<1x128xf32>,
    %104 = vector.extract_strided_slice %7 {offsets = [0, 6016], sizes = [1, 128], strides = [1, 1]} : vector<1x6144xf32> to vector<1x128xf32>
    %c48 = arith.constant 48 : index
    %c0_59 = arith.constant 0 : index
    %105 = vector.load %arg8[%c48, %c0_59] : memref<56x128xf32, #tpu.memory_space<vmem>>, vector<1x128xf32>
    tpu.vector_store %arg8[%c48, %c0_59], %104 {strides = array<i32>} : memref<56x128xf32, #tpu.memory_space<vmem>>, vector<1x128xf32>,
    %c0_60 = arith.constant 0 : index
    %c0_61 = arith.constant 0 : index
    %106 = vector.load %arg8[%c0_60, %c0_61] : memref<56x128xf32, #tpu.memory_space<vmem>>, vector<56x128xf32>
    %c0_62 = arith.constant 0 : index
    %c0_63 = arith.constant 0 : index
    %107 = vector.load %arg5[%c0_62, %c0_63] : memref<128x128xf32, #tpu.memory_space<vmem>>, vector<128x128xf32>
    %cst_64 = arith.constant dense<0.000000e+00> : vector<56x128xf32>
    %108 = tpu.matmul %106, %107, %cst_64 {dimension_numbers = #tpu.dot_dimension_numbers<[1], [0], [0], [1], [0, 0, 1, 1], [], []>} : vector<56x128xf32>, vector<128x128xf32>, vector<56x128xf32> -> vector<56x128xf32>
    %c0_65 = arith.constant 0 : index
    %109 = memref.load %arg6[%c0_65] : memref<8xf32, #tpu.memory_space<smem>>
    %c1_66 = arith.constant 1 : index
    %110 = memref.load %arg6[%c1_66] : memref<8xf32, #tpu.memory_space<smem>>
    %c2_67 = arith.constant 2 : index
    %111 = memref.load %arg6[%c2_67] : memref<8xf32, #tpu.memory_space<smem>>
    %c3_68 = arith.constant 3 : index
    %112 = memref.load %arg6[%c3_68] : memref<8xf32, #tpu.memory_space<smem>>
    %c4_69 = arith.constant 4 : index
    %113 = memref.load %arg6[%c4_69] : memref<8xf32, #tpu.memory_space<smem>>
    %114 = vector.extract_strided_slice %106 {offsets = [0, 0], sizes = [49, 128], strides = [1, 1]} : vector<56x128xf32> to vector<49x128xf32>
    %115 = vector.broadcast %109 : f32 to vector<49x128xf32>
    %116 = arith.mulf %115, %114 : vector<49x128xf32>
    %117 = vector.extract_strided_slice %108 {offsets = [0, 0], sizes = [49, 128], strides = [1, 1]} : vector<56x128xf32> to vector<49x128xf32>
    %118 = vector.broadcast %110 : f32 to vector<49x128xf32>
    %119 = arith.mulf %118, %117 : vector<49x128xf32>
    %120 = arith.addf %116, %119 : vector<49x128xf32>
    %121 = vector.extract_strided_slice %106 {offsets = [1, 0], sizes = [49, 128], strides = [1, 1]} : vector<56x128xf32> to vector<49x128xf32>
    %122 = vector.broadcast %111 : f32 to vector<49x128xf32>
    %123 = arith.mulf %122, %121 : vector<49x128xf32>
    %124 = arith.addf %120, %123 : vector<49x128xf32>
    %125 = vector.extract_strided_slice %108 {offsets = [1, 0], sizes = [49, 128], strides = [1, 1]} : vector<56x128xf32> to vector<49x128xf32>
    %126 = vector.broadcast %112 : f32 to vector<49x128xf32>
    %127 = arith.mulf %126, %125 : vector<49x128xf32>
    %128 = arith.addf %124, %127 : vector<49x128xf32>
    %129 = vector.broadcast %113 : f32 to vector<49x128xf32>
    %130 = arith.addf %128, %129 : vector<49x128xf32>
    %c0_70 = arith.constant 0 : index
    %c0_71 = arith.constant 0 : index
    %c0_72 = arith.constant 0 : index
    %131 = vector.load %arg7[%c0_70, %c0_71, %c0_72] : memref<1x49x128xf32, #tpu.memory_space<vmem>>, vector<1x49x128xf32>
    %132 = vector.shape_cast %131 : vector<1x49x128xf32> to vector<49x128xf32>
    %133 = vector.shape_cast %130 : vector<49x128xf32> to vector<1x49x128xf32>
    tpu.vector_store %arg7[%c0_70, %c0_71, %c0_72], %133 {strides = array<i32>} : memref<1x49x128xf32, #tpu.memory_space<vmem>>, vector<1x49x128xf32>,
    return
  }
  func.func @transform_0(%arg0: i32) -> (i32, i32, i32) {
    %c0_i32 = arith.constant 0 : i32
    %c0_i32_0 = arith.constant 0 : i32
    %c0_i32_1 = arith.constant 0 : i32
    return %arg0, %c0_i32, %c0_i32_0 : i32, i32, i32
  }
  func.func @transform_1(%arg0: i32) -> (i32, i32) {
    %c0_i32 = arith.constant 0 : i32
    %c0_i32_0 = arith.constant 0 : i32
    %c0_i32_1 = arith.constant 0 : i32
    return %c0_i32, %c0_i32_0 : i32, i32
  }
  func.func @transform_2(%arg0: i32) -> (i32, i32) {
    %c0_i32 = arith.constant 0 : i32
    %c0_i32_0 = arith.constant 0 : i32
    %c0_i32_1 = arith.constant 0 : i32
    return %c0_i32, %c0_i32_0 : i32, i32
  }
  func.func @transform_3(%arg0: i32) -> (i32, i32) {
    %c0_i32 = arith.constant 0 : i32
    %c0_i32_0 = arith.constant 0 : i32
    %c0_i32_1 = arith.constant 0 : i32
    return %c0_i32, %c0_i32_0 : i32, i32
  }
  func.func @transform_4(%arg0: i32) -> (i32, i32) {
    %c0_i32 = arith.constant 0 : i32
    %c0_i32_0 = arith.constant 0 : i32
    %c0_i32_1 = arith.constant 0 : i32
    return %c0_i32, %c0_i32_0 : i32, i32
  }
  func.func @transform_5(%arg0: i32) -> i32 {
    %c0_i32 = arith.constant 0 : i32
    %c0_i32_0 = arith.constant 0 : i32
    return %c0_i32 : i32
  }
  func.func @transform_6(%arg0: i32) -> (i32, i32, i32) {
    %c0_i32 = arith.constant 0 : i32
    %c0_i32_0 = arith.constant 0 : i32
    %c0_i32_1 = arith.constant 0 : i32
    return %arg0, %c0_i32, %c0_i32_0 : i32, i32, i32
  }
}

</mosaic_0001>

<bundles_post_ra>
// kernel: net_forward_batch.1
= control target key start
LH: loop header
LB: loop body
LE: loop exit
PB: predicated region body
PF: predicated region fallthrough
CT: control target
= control target key end

     0   :  { %11 = vsyncpa [#allocation4], 0  ;;  %s2956_s0 = inlined_call_operand.vmem [shape: f32[4,1,432], index: 0, kind: input, shape index: {}]   ;;  %s2957_s1 = inlined_call_operand.vmem [shape: f32[432,48], index: 1, kind: input, shape index: {}]   ;;  %s2958_s2 = inlined_call_operand.hbm [shape: f32[48,6144], index: 2, kind: input, shape index: {}]   ;;  %s2959_s3 = inlined_call_operand.hbm [shape: f32[1,6144], index: 3, kind: input, shape index: {}]   ;;  %s2960_s4 = inlined_call_operand.hbm [shape: f32[128,128], index: 4, kind: input, shape index: {}]   ;;  %s2961_s5 = inlined_call_operand.hbm [shape: f32[8], index: 5, kind: input, shape index: {}]   ;;  %s2962_s6 = inlined_call_operand.vmem [shape: f32[4,49,128], index: 6, kind: output, shape index: {}]  }
   0x1   :  { %12 = vsyncpa [#allocation7], 0 }
   0x2   :  { %13 = vsyncpa [#allocation5], 0  ;;  %s2452_s21 = smov 0  }
   0x3 LB: > { %s210_s24 = sshll.u32 %s2959_s3, 4  ;;  %s2461_s25 = sadd.s32 4294967295, %s2406_s21   ;;  %s2406_s21 = sphi %s2452_s21, %s19_s21   ;;  %s211_s24 = int_to_ptr.hbm [resolvable:$true] %s210_s24 }
   0x4   : > { %p2160_p0 = scmp.ge.s32.totalorder %s2406_s21, 1  ;;  %p181_p1 = scmp.lt.s32.totalorder %s2406_s21, 5 }
   0x5   : > { %p2258_p2 = scmp.eq.s32.totalorder %s2461_s25, 0  ;;  %s2408_s27 = smov [#allocation6]  }
   0x6   : > { %p2466_p3 = pnand %p2160_p0, %p181_p1  ;;  %s212_s28 = sshll.u32 %s2408_s27, 4  ;;  %s213_s28 = int_to_ptr.vmem [resolvable:$true] %s212_s28 }
   0x7   : > { %s195_s7 = sshll.u32 %s2958_s2, 4  ;;  %s2409_s9 = smov [#allocation3]   ;;  %s196_s7 = int_to_ptr.hbm [resolvable:$true] %s195_s7 }
   0x8   : > { %p2245_p4 = pneg %p2466_p3  ;;  %s197_s10 = sshll.u32 %s2409_s9, 4  ;;  %s198_s10 = int_to_ptr.vmem [resolvable:$true] %s197_s10 }
   0x9   : > { %s221_s13 = sshll.u32 %s2960_s4, 4  ;;  %s2410_s14 = smov 6144   ;;  %s222_s13 = int_to_ptr.hbm [resolvable:$true] %s221_s13 }
   0xa   : > { %p2477_p5 = pnand %p2258_p2, %p2245_p4  ;;  %s2411_s15 = smov 384  }
   0xb   : > { %s2412_s16 = smov [#allocation8]   ;;  %s2413_s18 = smov 128  }
   0xc   : > { %2251 = dma.hbm_to_vmem [thread:$0]  (!%p2477_p5), %s211_s24, 768, %s213_s28, [#allocation7]  }
   0xd   : > { %2248 = dma.hbm_to_vmem [thread:$0]  (!%p2477_p5), %s196_s7, 36864, %s198_s10, [#allocation4], %s2410_s14, %s2410_s14, %s2411_s15  }
   0xe   : > { %s223_s17 = sshll.u32 %s2412_s16, 4  ;;  %s2414_s19 = smov 8   ;;  %s224_s17 = int_to_ptr.vmem [resolvable:$true] %s223_s17 }
   0xf   : > { %2254 = dma.hbm_to_vmem [thread:$0]  (!%p2477_p5), %s222_s13, 2048, %s224_s17, [#allocation7], %s2413_s18, %s2413_s18, %s2414_s19  }
  0x10   : > { %s236_s23 = sshll.u32 %s2961_s5, 4  ;;  %s2415_s27 = smov [#allocation9]   ;;  %s237_s23 = int_to_ptr.hbm [resolvable:$true] %s236_s23 }
  0x11   : > { %2257 = dma.hbm_to_smem (!%p2477_p5), %s237_s23, 16, %s2415_s27, [#allocation5]  }
  0x12   : > { %256 = sbr.rel (%p2466_p3) target bundleno = 653 (0x28d), region = 44 }
  0x17   : > { %2393 = dma.done.wait (%p2258_p2), [#allocation4], 36864  }
  0x18   : > { %2395 = vsyncadd (%p2258_p2), [#allocation4], 4294930432 }
  0x19   : > { %2397 = dma.done.wait (%p2258_p2), [#allocation7], 2816  }
  0x1a   : > { %2399 = vsyncadd (%p2258_p2), [#allocation7], 4294964480 }
  0x1b   : > { %2401 = dma.done.wait (%p2258_p2), [#allocation5], 16  }
  0x1c   : > { %2403 = vsyncadd (%p2258_p2), [#allocation5], 4294967280 }
  0x1d   : > { %278 = sfence }
  0x1e   : > { %v359_v0 = vld [vmem:[%s2957_s1 + $0x178] sm:$0xff]  ;;  %v358_v1 = vld [vmem:[%s2957_s1 + $0x170] sm:$0xff]  ;;  %v357_v4 = vld [vmem:[%s2957_s1 + $0x168] sm:$0xff]  ;;  %p302_p6 = scmp.lt.s32.totalorder %s2461_s25, 3  ;;  %vm374_vm0 = vcmask 392192   ;;  %vm1975_vm1 = vcmask 1046528  }
  0x1f   : > { %417 = vmatpush.msra.mxu3 %v359_v0  ;;  %v327_v2 = vld [vmem:[%s2957_s1 + $0x78] sm:$0xff]  ;;  %v326_v5 = vld [vmem:[%s2957_s1 + $0x70] sm:$0xff]  ;;  %v325_v7 = vld [vmem:[%s2957_s1 + $0x68] sm:$0xff]  ;;  %s1932_s29 = sld [smem:[#allocation9]] }
  0x20   : > { %v343_v3 = vld [vmem:[%s2957_s1 + $0xf8] sm:$0xff]  ;;  %377 = vmatpush.msra.mxu0 %v327_v2  ;;  %v342_v6 = vld [vmem:[%s2957_s1 + $0xf0] sm:$0xff]  ;;  %v341_v8 = vld [vmem:[%s2957_s1 + $0xe8] sm:$0xff]  ;;  %s2966_s25 = smov (!%p302_p6, %s2461_s25), 3  ;;  %s2222_s30 = sld [smem:[#allocation9 + $0x1]] }
  0x21   : > { %397 = vmatpush.msra.mxu1 %v343_v3  ;;  %418 = vmatpush.msra.mxu3 %v358_v1  ;;  %v356_v9 = vld [vmem:[%s2957_s1 + $0x160] sm:$0xff]  ;;  %v355_v12 = vld [vmem:[%s2957_s1 + $0x158] sm:$0xff]  ;;  %v354_v15 = vld [vmem:[%s2957_s1 + $0x150] sm:$0xff]  ;;  %s2171_s28 = sshll.u32 %s2966_s25, 2  ;;  %s2224_s7 = sld [smem:[#allocation9 + $0x3]] }
  0x22   : > { %378 = vmatpush.msra.mxu0 %v326_v5  ;;  %v324_v10 = vld [vmem:[%s2957_s1 + $0x60] sm:$0xff]  ;;  %v323_v13 = vld [vmem:[%s2957_s1 + $0x58] sm:$0xff]  ;;  %v322_v16 = vld [vmem:[%s2957_s1 + $0x50] sm:$0xff]  ;;  %s305_s17 = scalar_lea.vmem %s2956_s0, %s2171_s28  ;;  %s2223_s28 = sld [smem:[#allocation9 + $0x2]] }
  0x23   : > { %398 = vmatpush.msra.mxu1 %v342_v6  ;;  %419 = vmatpush.msra.mxu3 %v357_v4  ;;  %v340_v11 = vld [vmem:[%s2957_s1 + $0xe0] sm:$0xff]  ;;  %v339_v14 = vld [vmem:[%s2957_s1 + $0xd8] sm:$0xff]  ;;  %v338_v17 = vld [vmem:[%s2957_s1 + $0xd0] sm:$0xff]  ;;  %s2225_s8 = sld [smem:[#allocation9 + $0x4]]  ;;  %s2228_s9 = smul.u32 56, %s2966_s25 }
  0x24   : > { %379 = vmatpush.msra.mxu0 %v325_v7  ;;  %v353_v18 = vld [vmem:[%s2957_s1 + $0x148] sm:$0xff]  ;;  %v352_v21 = vld [vmem:[%s2957_s1 + $0x140] sm:$0xff]  ;;  %v351_v24 = vld [vmem:[%s2957_s1 + $0x138] sm:$0xff] }
  0x25   : > { %399 = vmatpush.msra.mxu1 %v341_v8  ;;  %420 = vmatpush.msra.mxu3 %v356_v9  ;;  %v321_v19 = vld [vmem:[%s2957_s1 + $0x48] sm:$0xff]  ;;  %v320_v22 = vld [vmem:[%s2957_s1 + $0x40] sm:$0xff]  ;;  %v319_v25 = vld [vmem:[%s2957_s1 + $0x38] sm:$0xff]  ;;  %s2915_s12 = scalar_lea.vmem %s2962_s6, %s2228_s9 }
  0x26   : > { %380 = vmatpush.msra.mxu0 %v324_v10  ;;  %v337_v20 = vld [vmem:[%s2957_s1 + $0xc8] sm:$0xff]  ;;  %v336_v23 = vld [vmem:[%s2957_s1 + $0xc0] sm:$0xff]  ;;  %v335_v26 = vld [vmem:[%s2957_s1 + $0xb8] sm:$0xff] }
  0x27   : > { %400 = vmatpush.msra.mxu1 %v340_v11  ;;  %421 = vmatpush.msra.mxu3 %v355_v12  ;;  %v350_v27 = vld [vmem:[%s2957_s1 + $0x130] sm:$0xff]  ;;  %v349_v30 = vld [vmem:[%s2957_s1 + $0x128] sm:$0xff]  ;;  %v709_v33 = vld [vmem:[#allocation3 + $0x7e0] sm:$0xff] }
  0x28   : > { %381 = vmatpush.msra.mxu0 %v323_v13  ;;  %v318_v28 = vld [vmem:[%s2957_s1 + $0x30] sm:$0xff]  ;;  %v317_v31 = vld [vmem:[%s2957_s1 + $0x28] sm:$0xff]  ;;  %v348_v34 = vld [vmem:[%s2957_s1 + $0x120] sm:$0xff]  ;;  %1106 = vmatpush.msra.mxu2 %v709_v33 }
  0x29   : > { %401 = vmatpush.msra.mxu1 %v339_v14  ;;  %422 = vmatpush.msra.mxu3 %v354_v15  ;;  %v334_v29 = vld [vmem:[%s2957_s1 + $0xb0] sm:$0xff]  ;;  %v333_v32 = vld [vmem:[%s2957_s1 + $0xa8] sm:$0xff]  ;;  %v661_v35 = vld [vmem:[#allocation3 + $0x660] sm:$0xff] }
  0x2a   : > { %382 = vmatpush.msra.mxu0 %v322_v16  ;;  %v316_v36 = vld [vmem:[%s2957_s1 + $0x20] sm:$0xff]  ;;  %v347_v38 = vld [vmem:[%s2957_s1 + $0x118] sm:$0xff]  ;;  %1107 = vmatpush.msra.mxu2 %v661_v35  ;;  %v346_v42 = vld [vmem:[%s2957_s1 + $0x110] sm:$0xff] }
  0x2b   : > { %402 = vmatpush.msra.mxu1 %v338_v17  ;;  %423 = vmatpush.msra.mxu3 %v353_v18  ;;  %v332_v37 = vld [vmem:[%s2957_s1 + $0xa0] sm:$0xff]  ;;  %v613_v39 = vld [vmem:[#allocation3 + $0x4e0] sm:$0xff]  ;;  %v314_v44 = vld [vmem:[%s2957_s1 + $0x10] sm:$0xff] }
  0x2c   : > { %383 = vmatpush.msra.mxu0 %v321_v19  ;;  %v315_v40 = vld [vmem:[%s2957_s1 + $0x18] sm:$0xff]  ;;  %v330_v45 = vld [vmem:[%s2957_s1 + $0x90] sm:$0xff]  ;;  %1108 = vmatpush.msra.mxu2 %v613_v39  ;;  %v345_v46 = vld [vmem:[%s2957_s1 + $0x108] sm:$0xff] }
  0x2d   : > { %403 = vmatpush.msra.mxu1 %v337_v20  ;;  %424 = vmatpush.msra.mxu3 %v352_v21  ;;  %v331_v41 = vld [vmem:[%s2957_s1 + $0x98] sm:$0xff]  ;;  %v311_v47 = vld [vmem:[%s305_s17] sm:$0xf]  ;;  %v313_v49 = vld [vmem:[%s2957_s1 + $0x8] sm:$0xff] }
  0x2e   : > { %384 = vmatpush.msra.mxu0 %v320_v22  ;;  %v565_v43 = vld [vmem:[#allocation3 + $0x360] sm:$0xff]  ;;  %v329_v50 = vld [vmem:[%s2957_s1 + $0x88] sm:$0xff]  ;;  %v344_v51 = vld [vmem:[%s2957_s1 + $0x100] sm:$0xff]  ;;  %v369_v53 = vperm.slane %v311_v47, 2  ;;  %v367_v56 = vperm.slane %v311_v47, 0  ;;  %v368_v58 = vperm.slane %v311_v47, 1 }
  0x2f   : > { %404 = vmatpush.msra.mxu1 %v336_v23  ;;  %425 = vmatpush.msra.mxu3 %v351_v24  ;;  %v517_v48 = vld [vmem:[#allocation3 + $0x1e0] sm:$0xff]  ;;  %v365_v52 = vld [vmem:[%s2957_s1 + $0x1a8] sm:$0xff]  ;;  %v312_v54 = vld [vmem:[%s2957_s1] sm:$0xff]  ;;  %v370_v6 = vperm.slane %v311_v47, 3 }
  0x30   : > { %385 = vmatpush.msra.mxu0 %v319_v25  ;;  %1109 = vmatpush.msra.mxu2 %v565_v43  ;;  %v328_v55 = vld [vmem:[%s2957_s1 + $0x80] sm:$0xff]  ;;  %v699_v59 = vld [vmem:[#allocation3 + $0x790] sm:$0xff]  ;;  %v363_v60 = vld [vmem:[%s2957_s1 + $0x198] sm:$0xff] }
  0x31   : > { %405 = vmatpush.msra.mxu1 %v335_v26  ;;  %426 = vmatpush.msra.mxu3 %v350_v27  ;;  %v364_v57 = vld [vmem:[%s2957_s1 + $0x1a0] sm:$0xff]  ;;  %v700_v61 = vld [vmem:[#allocation3 + $0x798] sm:$0xff]  ;;  %v651_v62 = vld [vmem:[#allocation3 + $0x610] sm:$0xff] }
  0x32   : > { %386 = vmatpush.msra.mxu0 %v318_v28  ;;  %1110 = vmatpush.msra.mxu2 %v517_v48  ;;  %v362_v63 = vld [vmem:[%s2957_s1 + $0x190] sm:$0xff]  ;;  %v603_v1 = vld [vmem:[#allocation3 + $0x490] sm:$0xff]  ;;  %v360_v5 = vld [vmem:[%s2957_s1 + $0x180] sm:$0xff] }
  0x33   : > { %406 = vmatpush.msra.mxu1 %v334_v29  ;;  %427 = vmatpush.msra.mxu3 %v349_v30  ;;  %v652_v0 = vld [vmem:[#allocation3 + $0x618] sm:$0xff]  ;;  %v361_v2 = vld [vmem:[%s2957_s1 + $0x188] sm:$0xff]  ;;  %v697_v9 = vld [vmem:[#allocation3 + $0x780] sm:$0xff] }
  0x34   : > { %387 = vmatpush.msra.mxu0 %v317_v31  ;;  %v604_v3 = vld [vmem:[#allocation3 + $0x498] sm:$0xff]  ;;  %v555_v4 = vld [vmem:[#allocation3 + $0x310] sm:$0xff]  ;;  %v649_v11 = vld [vmem:[#allocation3 + $0x600] sm:$0xff] }
  0x35   : > { %407 = vmatpush.msra.mxu1 %v333_v32  ;;  %428 = vmatpush.msra.mxu3 %v348_v34  ;;  %v556_v7 = vld [vmem:[#allocation3 + $0x318] sm:$0xff]  ;;  %v507_v8 = vld [vmem:[#allocation3 + $0x190] sm:$0xff]  ;;  %v601_v12 = vld [vmem:[#allocation3 + $0x480] sm:$0xff] }
  0x36   : > { %388 = vmatpush.msra.mxu0 %v316_v36  ;;  %v508_v10 = vld [vmem:[#allocation3 + $0x198] sm:$0xff]  ;;  %v553_v13 = vld [vmem:[#allocation3 + $0x300] sm:$0xff]  ;;  %v459_v16 = vld [vmem:[#allocation3 + $0x10] sm:$0xff] }
  0x37   : > { %408 = vmatpush.msra.mxu1 %v332_v37  ;;  %429 = vmatpush.msra.mxu3 %v347_v38  ;;  %v505_v14 = vld [vmem:[#allocation3 + $0x180] sm:$0xff]  ;;  %v460_v17 = vld [vmem:[#allocation3 + $0x18] sm:$0xff]  ;;  %v698_v19 = vld [vmem:[#allocation3 + $0x788] sm:$0xff] }
  0x38   : > { %389 = vmatpush.msra.mxu0 %v315_v40  ;;  %v457_v15 = vld [vmem:[#allocation3] sm:$0xff]  ;;  %v704_v21 = vld [vmem:[#allocation3 + $0x7b8] sm:$0xff]  ;;  %v650_v23 = vld [vmem:[#allocation3 + $0x608] sm:$0xff] }
  0x39   : > { %409 = vmatpush.msra.mxu1 %v331_v41  ;;  %430 = vmatpush.msra.mxu3 %v346_v42  ;;  %v469_v18 = vld [vmem:[#allocation3 + $0x60] sm:$0xff]  ;;  %v656_v25 = vld [vmem:[#allocation3 + $0x638] sm:$0xff]  ;;  %v602_v27 = vld [vmem:[#allocation3 + $0x488] sm:$0xff] }
  0x3a   : > { %390 = vmatpush.msra.mxu0 %v314_v44  ;;  %1111 = vmatpush.msra.mxu2 %v469_v18  ;;  %v701_v20 = vld [vmem:[#allocation3 + $0x7a0] sm:$0xff]  ;;  %v608_v29 = vld [vmem:[#allocation3 + $0x4b8] sm:$0xff]  ;;  %v554_v31 = vld [vmem:[#allocation3 + $0x308] sm:$0xff] }
  0x3b   : > { %410 = vmatpush.msra.mxu1 %v330_v45  ;;  %431 = vmatpush.msra.mxu3 %v345_v46  ;;  %v713_v22 = vld [vmem:[#allocation3 + $0x800] sm:$0xff]  ;;  %v560_v33 = vld [vmem:[#allocation3 + $0x338] sm:$0xff]  ;;  %v506_v35 = vld [vmem:[#allocation3 + $0x188] sm:$0xff] }
  0x3c   : > { %391 = vmatpush.msra.mxu0 %v313_v49  ;;  %v653_v24 = vld [vmem:[#allocation3 + $0x620] sm:$0xff]  ;;  %1186 = vmatpush.msrb.mxu2 %v713_v22  ;;  %v512_v37 = vld [vmem:[#allocation3 + $0x1b8] sm:$0xff]  ;;  %v458_v39 = vld [vmem:[#allocation3 + $0x8] sm:$0xff] }
  0x3d   : > { %411 = vmatpush.msra.mxu1 %v329_v50  ;;  %432 = vmatpush.msra.mxu3 %v344_v51  ;;  %v665_v26 = vld [vmem:[#allocation3 + $0x680] sm:$0xff]  ;;  %v464_v41 = vld [vmem:[#allocation3 + $0x38] sm:$0xff]  ;;  %v702_v50 = vld [vmem:[#allocation3 + $0x7a8] sm:$0xff] }
  0x3e   : > { %392 = vmatpush.msra.mxu0 %v312_v54  ;;  %433 = vmatmul.f32.vlgmr.msra.gmra.mxu3 %v369_v53  ;;  %v605_v28 = vld [vmem:[#allocation3 + $0x4a0] sm:$0xff]  ;;  %v703_v51 = vld [vmem:[#allocation3 + $0x7b0] sm:$0xff]  ;;  %v654_v53 = vld [vmem:[#allocation3 + $0x628] sm:$0xff] }
  0x3f   : > { %447 = vmatpush.msrb.mxu3 %v365_v52  ;;  %412 = vmatpush.msra.mxu1 %v328_v55  ;;  %v617_v30 = vld [vmem:[#allocation3 + $0x500] sm:$0xff]  ;;  %v655_v55 = vld [vmem:[#allocation3 + $0x630] sm:$0xff]  ;;  %v610_v18 = vld [vmem:[#allocation3 + $0x4c8] sm:$0xff] }
  0x40   : > { %393 = vmatmul.f32.vlgmr.msra.gmra.mxu0 %v367_v56  ;;  %413 = vmatmul.f32.vlgmr.msra.gmra.mxu1 %v368_v58  ;;  %v557_v32 = vld [vmem:[#allocation3 + $0x320] sm:$0xff]  ;;  %v562_v22 = vld [vmem:[#allocation3 + $0x348] sm:$0xff] }
  0x41   : > { %448 = vmatpush.msrb.mxu3 %v364_v57  ;;  %906 = vmatpush.msrb.mxu0 %v699_v59  ;;  %v569_v34 = vld [vmem:[#allocation3 + $0x380] sm:$0xff]  ;;  %v606_v57 = vld [vmem:[#allocation3 + $0x4a8] sm:$0xff]  ;;  %v607_v59 = vld [vmem:[#allocation3 + $0x4b0] sm:$0xff] }
  0x42   : > { %926 = vmatpush.msrb.mxu1 %v700_v61  ;;  %1187 = vmatpush.msrb.mxu2 %v665_v26  ;;  %v509_v36 = vld [vmem:[#allocation3 + $0x1a0] sm:$0xff]  ;;  %v558_v61 = vld [vmem:[#allocation3 + $0x328] sm:$0xff] }
  0x43   : > { %449 = vmatpush.msrb.mxu3 %v363_v60  ;;  %907 = vmatpush.msrb.mxu0 %v651_v62  ;;  %v521_v38 = vld [vmem:[#allocation3 + $0x200] sm:$0xff]  ;;  %v514_v26 = vld [vmem:[#allocation3 + $0x1c8] sm:$0xff] }
  0x44   : > { %927 = vmatpush.msrb.mxu1 %v652_v0  ;;  %1188 = vmatpush.msrb.mxu2 %v617_v30  ;;  %v461_v40 = vld [vmem:[#allocation3 + $0x20] sm:$0xff]  ;;  %v466_v30 = vld [vmem:[#allocation3 + $0x48] sm:$0xff] }
  0x45   : > { %450 = vmatpush.msrb.mxu3 %v362_v63  ;;  %908 = vmatpush.msrb.mxu0 %v603_v1  ;;  %v473_v42 = vld [vmem:[#allocation3 + $0x80] sm:$0xff]  ;;  %v559_v63 = vld [vmem:[#allocation3 + $0x330] sm:$0xff] }
  0x46   : > { %928 = vmatpush.msrb.mxu1 %v604_v3  ;;  %1189 = vmatpush.msrb.mxu2 %v569_v34  ;;  %v705_v52 = vld [vmem:[#allocation3 + $0x7c0] sm:$0xff]  ;;  %v511_v3 = vld [vmem:[#allocation3 + $0x1b0] sm:$0xff]  ;;  %v710_v34 = vld [vmem:[#allocation3 + $0x7e8] sm:$0xff] }
  0x47   : > { %451 = vmatpush.msrb.mxu3 %v361_v2  ;;  %909 = vmatpush.msrb.mxu0 %v555_v4  ;;  %v717_v54 = vld [vmem:[#allocation3 + $0x820] sm:$0xff]  ;;  %v510_v2 = vld [vmem:[#allocation3 + $0x1a8] sm:$0xff] }
  0x48   : > { %929 = vmatpush.msrb.mxu1 %v556_v7  ;;  %1190 = vmatpush.msrb.mxu2 %v521_v38  ;;  %v657_v56 = vld [vmem:[#allocation3 + $0x640] sm:$0xff]  ;;  %v463_v7 = vld [vmem:[#allocation3 + $0x30] sm:$0xff]  ;;  %v662_v38 = vld [vmem:[#allocation3 + $0x668] sm:$0xff] }
  0x49   : > { %452 = vmatpush.msrb.mxu3 %v360_v5  ;;  %910 = vmatpush.msrb.mxu0 %v507_v8  ;;  %v669_v58 = vld [vmem:[#allocation3 + $0x6a0] sm:$0xff] }
  0x4a   : > { %2173 = vmatmul.msk.f32.vlgmr.msrb.gmra.mxu3 %vm374_vm0, %v370_v6  ;;  %930 = vmatpush.msrb.mxu1 %v508_v10  ;;  %v609_v60 = vld [vmem:[#allocation3 + $0x4c0] sm:$0xff]  ;;  %v462_v6 = vld [vmem:[#allocation3 + $0x28] sm:$0xff] }
  0x4b   : > { %866 = vmatpush.msra.mxu3 %v697_v9  ;;  %911 = vmatpush.msrb.mxu0 %v459_v16  ;;  %v621_v62 = vld [vmem:[#allocation3 + $0x520] sm:$0xff]  ;;  %v706_v10 = vld [vmem:[#allocation3 + $0x7c8] sm:$0xff]  ;;  %v660_v16 = vld [vmem:[#allocation3 + $0x658] sm:$0xff] }
  0x4c   : > { %931 = vmatpush.msrb.mxu1 %v460_v17  ;;  %1191 = vmatpush.msrb.mxu2 %v473_v42  ;;  %v561_v0 = vld [vmem:[#allocation3 + $0x340] sm:$0xff] }
  0x4d   : > { %867 = vmatpush.msra.mxu3 %v649_v11  ;;  %946 = vmatpush.msra.mxu0 %v701_v20  ;;  %v573_v1 = vld [vmem:[#allocation3 + $0x3a0] sm:$0xff]  ;;  %v707_v11 = vld [vmem:[#allocation3 + $0x7d0] sm:$0xff]  ;;  %v612_v20 = vld [vmem:[#allocation3 + $0x4d8] sm:$0xff] }
  0x4e   : > { %1006 = vmatpush.msra.mxu1 %v704_v21  ;;  %v513_v4 = vld [vmem:[#allocation3 + $0x1c0] sm:$0xff] }
  0x4f   : > { %868 = vmatpush.msra.mxu3 %v601_v12  ;;  %947 = vmatpush.msra.mxu0 %v653_v24  ;;  %v525_v5 = vld [vmem:[#allocation3 + $0x220] sm:$0xff]  ;;  %v708_v12 = vld [vmem:[#allocation3 + $0x7d8] sm:$0xff] }
  0x50   : > { %1007 = vmatpush.msra.mxu1 %v656_v25  ;;  %v465_v8 = vld [vmem:[#allocation3 + $0x40] sm:$0xff]  ;;  %v564_v24 = vld [vmem:[#allocation3 + $0x358] sm:$0xff] }
  0x51   : > { %869 = vmatpush.msra.mxu3 %v553_v13  ;;  %948 = vmatpush.msra.mxu0 %v605_v28  ;;  %v477_v9 = vld [vmem:[#allocation3 + $0xa0] sm:$0xff]  ;;  %v516_v28 = vld [vmem:[#allocation3 + $0x1d8] sm:$0xff] }
  0x52   : > { %1008 = vmatpush.msra.mxu1 %v608_v29  ;;  %v721_v13 = vld [vmem:[#allocation3 + $0x840] sm:$0xff] }
  0x53   : > { %870 = vmatpush.msra.mxu3 %v505_v14  ;;  %949 = vmatpush.msra.mxu0 %v557_v32  ;;  %v658_v14 = vld [vmem:[#allocation3 + $0x648] sm:$0xff]  ;;  %v673_v17 = vld [vmem:[#allocation3 + $0x6c0] sm:$0xff]  ;;  %v468_v32 = vld [vmem:[#allocation3 + $0x58] sm:$0xff] }
  0x54   : > { %1009 = vmatpush.msra.mxu1 %v560_v33  ;;  %v625_v21 = vld [vmem:[#allocation3 + $0x540] sm:$0xff] }
  0x55   : > { %871 = vmatpush.msra.mxu3 %v457_v15  ;;  %950 = vmatpush.msra.mxu0 %v509_v36  ;;  %v659_v15 = vld [vmem:[#allocation3 + $0x650] sm:$0xff]  ;;  %v577_v25 = vld [vmem:[#allocation3 + $0x3c0] sm:$0xff]  ;;  %v712_v36 = vld [vmem:[#allocation3 + $0x7f8] sm:$0xff] }
  0x56   : > { %1010 = vmatpush.msra.mxu1 %v512_v37  ;;  %v529_v29 = vld [vmem:[#allocation3 + $0x240] sm:$0xff] }
  0x57   : > { %886 = vmatpush.msrb.mxu3 %v698_v19  ;;  %951 = vmatpush.msra.mxu0 %v461_v40  ;;  %v611_v19 = vld [vmem:[#allocation3 + $0x4d0] sm:$0xff]  ;;  %v481_v33 = vld [vmem:[#allocation3 + $0xc0] sm:$0xff]  ;;  %v664_v40 = vld [vmem:[#allocation3 + $0x678] sm:$0xff] }
  0x58   : > { %1011 = vmatpush.msra.mxu1 %v464_v41  ;;  %v725_v37 = vld [vmem:[#allocation3 + $0x860] sm:$0xff]  ;;  %v614_v41 = vld [vmem:[#allocation3 + $0x4e8] sm:$0xff] }
  0x59   : > { %887 = vmatpush.msrb.mxu3 %v650_v23  ;;  %v563_v23 = vld [vmem:[#allocation3 + $0x350] sm:$0xff]  ;;  %v677_v42 = vld [vmem:[#allocation3 + $0x6e0] sm:$0xff] }
  0x5b   : > { %888 = vmatpush.msrb.mxu3 %v602_v27  ;;  %v515_v27 = vld [vmem:[#allocation3 + $0x1d0] sm:$0xff] }
  0x5d   : > { %889 = vmatpush.msrb.mxu3 %v554_v31  ;;  %v467_v31 = vld [vmem:[#allocation3 + $0x50] sm:$0xff] }
  0x5f   : > { %890 = vmatpush.msrb.mxu3 %v506_v35  ;;  %v711_v35 = vld [vmem:[#allocation3 + $0x7f0] sm:$0xff] }
  0x61   : > { %891 = vmatpush.msrb.mxu3 %v458_v39  ;;  %v663_v39 = vld [vmem:[#allocation3 + $0x670] sm:$0xff] }
  0xbd   : > { %v394_v44 = vpop.f32.mrf.mxu0  ;;  %v414_v45 = vpop.f32.mrf.mxu1 }
  0xbe   : > { %v415_v46 = vadd.f32 %v414_v45, %v394_v44  ;;  %v616_v44 = vld [vmem:[#allocation3 + $0x4f8] sm:$0xff]  ;;  %v566_v45 = vld [vmem:[#allocation3 + $0x368] sm:$0xff] }
  0xc1   : > { %v434_v43 = vpop.f32.mrf.mxu3 }
  0xc2   : > { %v435_v47 = vadd.f32 %v434_v43, %v415_v46  ;;  %v615_v43 = vld [vmem:[#allocation3 + $0x4f0] sm:$0xff]  ;;  %v629_v46 = vld [vmem:[#allocation3 + $0x560] sm:$0xff] }
  0xcd   : > { %v454_v48 = vpop.f32.mrf.mxu3 }
  0xce   : > { %v2680_v49 = vadd.f32 %v454_v48, %v435_v47  ;;  %v567_v47 = vld [vmem:[#allocation3 + $0x370] sm:$0xff]  ;;  %v568_v48 = vld [vmem:[#allocation3 + $0x378] sm:$0xff] }
  0xd0   : > { %2174 = vmatmul.msk.f32.vlgmr.msra.gmra.mxu3 %vm374_vm0, %v2680_v49  ;;  %2176 = vmatmul.msk.f32.vlgmr.msrb.gmra.mxu0 %vm374_vm0, %v2680_v49 }
  0xd1   : > { %2177 = vmatmul.msk.f32.vlgmr.msrb.gmra.mxu1 %vm374_vm0, %v2680_v49  ;;  %966 = vmatpush.msra.mxu3 %v702_v50  ;;  %v518_v50 = vld [vmem:[#allocation3 + $0x1e8] sm:$0xff] }
  0xd2   : > { %986 = vmatpush.msrb.mxu0 %v703_v51  ;;  %1026 = vmatpush.msrb.mxu1 %v705_v52  ;;  %v581_v51 = vld [vmem:[#allocation3 + $0x3e0] sm:$0xff]  ;;  %v519_v52 = vld [vmem:[#allocation3 + $0x1f0] sm:$0xff] }
  0xd3   : > { %2186 = vmatmul.msk.f32.vlgmr.msra.gmra.mxu2 %vm374_vm0, %v2680_v49  ;;  %967 = vmatpush.msra.mxu3 %v654_v53  ;;  %v520_v53 = vld [vmem:[#allocation3 + $0x1f8] sm:$0xff] }
  0xd4   : > { %1266 = vmatpush.msra.mxu2 %v717_v54  ;;  %987 = vmatpush.msrb.mxu0 %v655_v55  ;;  %v470_v54 = vld [vmem:[#allocation3 + $0x68] sm:$0xff]  ;;  %v533_v55 = vld [vmem:[#allocation3 + $0x260] sm:$0xff] }
  0xd5   : > { %1027 = vmatpush.msrb.mxu1 %v657_v56  ;;  %968 = vmatpush.msra.mxu3 %v606_v57  ;;  %v471_v56 = vld [vmem:[#allocation3 + $0x70] sm:$0xff]  ;;  %v472_v57 = vld [vmem:[#allocation3 + $0x78] sm:$0xff] }
  0xd6   : > { %1267 = vmatpush.msra.mxu2 %v669_v58  ;;  %988 = vmatpush.msrb.mxu0 %v607_v59  ;;  %v485_v58 = vld [vmem:[#allocation3 + $0xe0] sm:$0xff]  ;;  %v714_v59 = vld [vmem:[#allocation3 + $0x808] sm:$0xff] }
  0xd7   : > { %1028 = vmatpush.msrb.mxu1 %v609_v60  ;;  %969 = vmatpush.msra.mxu3 %v558_v61  ;;  %v715_v60 = vld [vmem:[#allocation3 + $0x810] sm:$0xff]  ;;  %v716_v61 = vld [vmem:[#allocation3 + $0x818] sm:$0xff] }
  0xd8   : > { %1268 = vmatpush.msra.mxu2 %v621_v62  ;;  %989 = vmatpush.msrb.mxu0 %v559_v63  ;;  %v666_v62 = vld [vmem:[#allocation3 + $0x688] sm:$0xff]  ;;  %v729_v63 = vld [vmem:[#allocation3 + $0x880] sm:$0xff] }
  0xd9   : > { %1029 = vmatpush.msrb.mxu1 %v561_v0  ;;  %2175 = vmatmul.msk.f32.vlgmr.msrb.gmra.mxu3 %vm374_vm0, %v2680_v49  ;;  %v667_v0 = vld [vmem:[#allocation3 + $0x690] sm:$0xff] }
  0xda   : > { %1269 = vmatpush.msra.mxu2 %v573_v1  ;;  %2178 = vmatmul.msk.f32.vlgmr.msra.gmra.mxu0 %vm374_vm0, %v2680_v49  ;;  %v668_v1 = vld [vmem:[#allocation3 + $0x698] sm:$0xff] }
  0xdb   : > { %970 = vmatpush.msra.mxu3 %v510_v2  ;;  %990 = vmatpush.msrb.mxu0 %v511_v3  ;;  %v618_v2 = vld [vmem:[#allocation3 + $0x508] sm:$0xff]  ;;  %v681_v3 = vld [vmem:[#allocation3 + $0x700] sm:$0xff] }
  0xdc   : > { %2181 = vmatmul.msk.f32.vlgmr.msra.gmra.mxu1 %vm374_vm0, %v2680_v49  ;;  %2190 = vmatmul.msk.f32.vlgmr.msrb.gmra.mxu2 %vm374_vm0, %v2680_v49 }
  0xdd   : > { %1030 = vmatpush.msrb.mxu1 %v513_v4  ;;  %1270 = vmatpush.msra.mxu2 %v525_v5  ;;  %v619_v4 = vld [vmem:[#allocation3 + $0x510] sm:$0xff]  ;;  %v620_v5 = vld [vmem:[#allocation3 + $0x518] sm:$0xff] }
  0xde   : > { %971 = vmatpush.msra.mxu3 %v462_v6  ;;  %991 = vmatpush.msrb.mxu0 %v463_v7  ;;  %v570_v6 = vld [vmem:[#allocation3 + $0x388] sm:$0xff]  ;;  %v633_v7 = vld [vmem:[#allocation3 + $0x580] sm:$0xff] }
  0xdf   : > { %1031 = vmatpush.msrb.mxu1 %v465_v8  ;;  %1271 = vmatpush.msra.mxu2 %v477_v9  ;;  %v571_v8 = vld [vmem:[#allocation3 + $0x390] sm:$0xff]  ;;  %v572_v9 = vld [vmem:[#allocation3 + $0x398] sm:$0xff] }
  0xe0   : > { %1046 = vmatpush.msrb.mxu3 %v706_v10  ;;  %1066 = vmatpush.msra.mxu0 %v707_v11  ;;  %v522_v10 = vld [vmem:[#allocation3 + $0x208] sm:$0xff]  ;;  %v585_v11 = vld [vmem:[#allocation3 + $0x400] sm:$0xff] }
  0xe1   : > { %1086 = vmatpush.msra.mxu1 %v708_v12  ;;  %1346 = vmatpush.msrb.mxu2 %v721_v13  ;;  %v523_v12 = vld [vmem:[#allocation3 + $0x210] sm:$0xff]  ;;  %v524_v13 = vld [vmem:[#allocation3 + $0x218] sm:$0xff] }
  0xe2   : > { %1047 = vmatpush.msrb.mxu3 %v658_v14  ;;  %1067 = vmatpush.msra.mxu0 %v659_v15  ;;  %v474_v14 = vld [vmem:[#allocation3 + $0x88] sm:$0xff]  ;;  %v537_v15 = vld [vmem:[#allocation3 + $0x280] sm:$0xff] }
  0xe3   : > { %1087 = vmatpush.msra.mxu1 %v660_v16  ;;  %1347 = vmatpush.msrb.mxu2 %v673_v17  ;;  %v475_v16 = vld [vmem:[#allocation3 + $0x90] sm:$0xff]  ;;  %v476_v17 = vld [vmem:[#allocation3 + $0x98] sm:$0xff] }
  0xe4   : > { %1048 = vmatpush.msrb.mxu3 %v610_v18  ;;  %1068 = vmatpush.msra.mxu0 %v611_v19  ;;  %v489_v18 = vld [vmem:[#allocation3 + $0x100] sm:$0xff]  ;;  %v718_v19 = vld [vmem:[#allocation3 + $0x828] sm:$0xff] }
  0xe5   : > { %1088 = vmatpush.msra.mxu1 %v612_v20  ;;  %1348 = vmatpush.msrb.mxu2 %v625_v21  ;;  %v719_v20 = vld [vmem:[#allocation3 + $0x830] sm:$0xff]  ;;  %v720_v21 = vld [vmem:[#allocation3 + $0x838] sm:$0xff] }
  0xe6   : > { %2179 = vmatmul.msk.f32.vlgmr.msra.gmra.mxu3 %vm374_vm0, %v2680_v49  ;;  %2180 = vmatmul.msk.f32.vlgmr.msrb.gmra.mxu0 %vm374_vm0, %v2680_v49 }
  0xe7   : > { %2182 = vmatmul.msk.f32.vlgmr.msrb.gmra.mxu1 %vm374_vm0, %v2680_v49  ;;  %2194 = vmatmul.msk.f32.vlgmr.msra.gmra.mxu2 %vm374_vm0, %v2680_v49 }
  0xe8   : > { %1049 = vmatpush.msrb.mxu3 %v562_v22  ;;  %1069 = vmatpush.msra.mxu0 %v563_v23  ;;  %v670_v22 = vld [vmem:[#allocation3 + $0x6a8] sm:$0xff]  ;;  %v733_v23 = vld [vmem:[#allocation3 + $0x8a0] sm:$0xff] }
  0xe9   : > { %1089 = vmatpush.msra.mxu1 %v564_v24  ;;  %1349 = vmatpush.msrb.mxu2 %v577_v25  ;;  %v671_v24 = vld [vmem:[#allocation3 + $0x6b0] sm:$0xff]  ;;  %v672_v25 = vld [vmem:[#allocation3 + $0x6b8] sm:$0xff] }
  0xea   : > { %1050 = vmatpush.msrb.mxu3 %v514_v26  ;;  %1070 = vmatpush.msra.mxu0 %v515_v27  ;;  %v622_v26 = vld [vmem:[#allocation3 + $0x528] sm:$0xff]  ;;  %v685_v27 = vld [vmem:[#allocation3 + $0x720] sm:$0xff] }
  0xeb   : > { %1090 = vmatpush.msra.mxu1 %v516_v28  ;;  %1350 = vmatpush.msrb.mxu2 %v529_v29  ;;  %v623_v28 = vld [vmem:[#allocation3 + $0x530] sm:$0xff]  ;;  %v624_v29 = vld [vmem:[#allocation3 + $0x538] sm:$0xff] }
  0xec   : > { %1051 = vmatpush.msrb.mxu3 %v466_v30  ;;  %1071 = vmatpush.msra.mxu0 %v467_v31  ;;  %v574_v30 = vld [vmem:[#allocation3 + $0x3a8] sm:$0xff]  ;;  %v637_v31 = vld [vmem:[#allocation3 + $0x5a0] sm:$0xff] }
  0xed   : > { %1091 = vmatpush.msra.mxu1 %v468_v32  ;;  %1351 = vmatpush.msrb.mxu2 %v481_v33  ;;  %v575_v32 = vld [vmem:[#allocation3 + $0x3b0] sm:$0xff]  ;;  %v576_v33 = vld [vmem:[#allocation3 + $0x3b8] sm:$0xff] }
  0xee   : > { %1126 = vmatpush.msra.mxu3 %v710_v34  ;;  %1146 = vmatpush.msrb.mxu0 %v711_v35  ;;  %v526_v34 = vld [vmem:[#allocation3 + $0x228] sm:$0xff]  ;;  %v589_v35 = vld [vmem:[#allocation3 + $0x420] sm:$0xff] }
  0xef   : > { %1166 = vmatpush.msrb.mxu1 %v712_v36  ;;  %1426 = vmatpush.msra.mxu2 %v725_v37  ;;  %v527_v36 = vld [vmem:[#allocation3 + $0x230] sm:$0xff]  ;;  %v528_v37 = vld [vmem:[#allocation3 + $0x238] sm:$0xff] }
  0xf0   : > { %2183 = vmatmul.msk.f32.vlgmr.msrb.gmra.mxu3 %vm374_vm0, %v2680_v49  ;;  %2184 = vmatmul.msk.f32.vlgmr.msra.gmra.mxu0 %vm374_vm0, %v2680_v49 }
  0xf1   : > { %2185 = vmatmul.msk.f32.vlgmr.msra.gmra.mxu1 %vm374_vm0, %v2680_v49  ;;  %1127 = vmatpush.msra.mxu3 %v662_v38  ;;  %v478_v38 = vld [vmem:[#allocation3 + $0xa8] sm:$0xff] }
  0xf2   : > { %1147 = vmatpush.msrb.mxu0 %v663_v39  ;;  %1167 = vmatpush.msrb.mxu1 %v664_v40  ;;  %v541_v39 = vld [vmem:[#allocation3 + $0x2a0] sm:$0xff]  ;;  %v479_v40 = vld [vmem:[#allocation3 + $0xb0] sm:$0xff] }
  0xf3   : > { %2198 = vmatmul.msk.f32.vlgmr.msrb.gmra.mxu2 %vm374_vm0, %v2680_v49  ;;  %1128 = vmatpush.msra.mxu3 %v614_v41  ;;  %v480_v41 = vld [vmem:[#allocation3 + $0xb8] sm:$0xff] }
  0xf4   : > { %1427 = vmatpush.msra.mxu2 %v677_v42  ;;  %1148 = vmatpush.msrb.mxu0 %v615_v43  ;;  %v493_v42 = vld [vmem:[#allocation3 + $0x120] sm:$0xff]  ;;  %v722_v43 = vld [vmem:[#allocation3 + $0x848] sm:$0xff] }
  0xf5   : > { %1168 = vmatpush.msrb.mxu1 %v616_v44  ;;  %1129 = vmatpush.msra.mxu3 %v566_v45  ;;  %v723_v44 = vld [vmem:[#allocation3 + $0x850] sm:$0xff]  ;;  %v724_v45 = vld [vmem:[#allocation3 + $0x858] sm:$0xff] }
  0xf6   : > { %1428 = vmatpush.msra.mxu2 %v629_v46  ;;  %1149 = vmatpush.msrb.mxu0 %v567_v47  ;;  %v674_v46 = vld [vmem:[#allocation3 + $0x6c8] sm:$0xff]  ;;  %v737_v47 = vld [vmem:[#allocation3 + $0x8c0] sm:$0xff] }
  0xf7   : > { %1169 = vmatpush.msrb.mxu1 %v568_v48  ;;  %1130 = vmatpush.msra.mxu3 %v518_v50  ;;  %v675_v48 = vld [vmem:[#allocation3 + $0x6d0] sm:$0xff]  ;;  %v676_v50 = vld [vmem:[#allocation3 + $0x6d8] sm:$0xff] }
  0xf8   : > { %1429 = vmatpush.msra.mxu2 %v581_v51  ;;  %1150 = vmatpush.msrb.mxu0 %v519_v52  ;;  %v626_v51 = vld [vmem:[#allocation3 + $0x548] sm:$0xff]  ;;  %v689_v52 = vld [vmem:[#allocation3 + $0x740] sm:$0xff] }
  0xf9   : > { %1170 = vmatpush.msrb.mxu1 %v520_v53  ;;  %1131 = vmatpush.msra.mxu3 %v470_v54  ;;  %v627_v53 = vld [vmem:[#allocation3 + $0x550] sm:$0xff]  ;;  %v628_v54 = vld [vmem:[#allocation3 + $0x558] sm:$0xff] }
  0xfa   : > { %1430 = vmatpush.msra.mxu2 %v533_v55  ;;  %1151 = vmatpush.msrb.mxu0 %v471_v56  ;;  %v578_v55 = vld [vmem:[#allocation3 + $0x3c8] sm:$0xff]  ;;  %v641_v56 = vld [vmem:[#allocation3 + $0x5c0] sm:$0xff] }
  0xfb   : > { %1171 = vmatpush.msrb.mxu1 %v472_v57  ;;  %2187 = vmatmul.msk.f32.vlgmr.msra.gmra.mxu3 %vm374_vm0, %v2680_v49  ;;  %v579_v57 = vld [vmem:[#allocation3 + $0x3d0] sm:$0xff] }
  0xfc   : > { %1431 = vmatpush.msra.mxu2 %v485_v58  ;;  %2188 = vmatmul.msk.f32.vlgmr.msrb.gmra.mxu0 %vm374_vm0, %v2680_v49  ;;  %v580_v58 = vld [vmem:[#allocation3 + $0x3d8] sm:$0xff] }
  0xfd   : > { %2189 = vmatmul.msk.f32.vlgmr.msrb.gmra.mxu1 %vm374_vm0, %v2680_v49  ;;  %1206 = vmatpush.msrb.mxu3 %v714_v59  ;;  %v530_v59 = vld [vmem:[#allocation3 + $0x248] sm:$0xff] }
  0xfe   : > { %1226 = vmatpush.msra.mxu0 %v715_v60  ;;  %1246 = vmatpush.msra.mxu1 %v716_v61  ;;  %v593_v60 = vld [vmem:[#allocation3 + $0x440] sm:$0xff]  ;;  %v531_v61 = vld [vmem:[#allocation3 + $0x250] sm:$0xff] }
  0xff   : > { %2202 = vmatmul.msk.f32.vlgmr.msra.gmra.mxu2 %vm374_vm0, %v2680_v49  ;;  %1207 = vmatpush.msrb.mxu3 %v666_v62  ;;  %v532_v62 = vld [vmem:[#allocation3 + $0x258] sm:$0xff] }
 0x100   : > { %1506 = vmatpush.msrb.mxu2 %v729_v63  ;;  %1227 = vmatpush.msra.mxu0 %v667_v0  ;;  %v482_v63 = vld [vmem:[#allocation3 + $0xc8] sm:$0xff]  ;;  %v545_v0 = vld [vmem:[#allocation3 + $0x2c0] sm:$0xff] }
 0x101   : > { %1247 = vmatpush.msra.mxu1 %v668_v1  ;;  %1208 = vmatpush.msrb.mxu3 %v618_v2  ;;  %v483_v1 = vld [vmem:[#allocation3 + $0xd0] sm:$0xff]  ;;  %v484_v2 = vld [vmem:[#allocation3 + $0xd8] sm:$0xff] }
 0x102   : > { %1507 = vmatpush.msrb.mxu2 %v681_v3  ;;  %1228 = vmatpush.msra.mxu0 %v619_v4  ;;  %v497_v3 = vld [vmem:[#allocation3 + $0x140] sm:$0xff]  ;;  %v726_v4 = vld [vmem:[#allocation3 + $0x868] sm:$0xff] }
 0x103   : > { %1248 = vmatpush.msra.mxu1 %v620_v5  ;;  %1209 = vmatpush.msrb.mxu3 %v570_v6  ;;  %v727_v5 = vld [vmem:[#allocation3 + $0x870] sm:$0xff]  ;;  %v728_v6 = vld [vmem:[#allocation3 + $0x878] sm:$0xff] }
 0x104   : > { %1508 = vmatpush.msrb.mxu2 %v633_v7  ;;  %1229 = vmatpush.msra.mxu0 %v571_v8  ;;  %v678_v7 = vld [vmem:[#allocation3 + $0x6e8] sm:$0xff]  ;;  %v741_v8 = vld [vmem:[#allocation3 + $0x8e0] sm:$0xff] }
 0x105   : > { %1249 = vmatpush.msra.mxu1 %v572_v9  ;;  %1210 = vmatpush.msrb.mxu3 %v522_v10  ;;  %v679_v9 = vld [vmem:[#allocation3 + $0x6f0] sm:$0xff]  ;;  %v680_v10 = vld [vmem:[#allocation3 + $0x6f8] sm:$0xff] }
 0x106   : > { %1509 = vmatpush.msrb.mxu2 %v585_v11  ;;  %1230 = vmatpush.msra.mxu0 %v523_v12  ;;  %v630_v11 = vld [vmem:[#allocation3 + $0x568] sm:$0xff]  ;;  %v693_v12 = vld [vmem:[#allocation3 + $0x760] sm:$0xff] }
 0x107   : > { %1250 = vmatpush.msra.mxu1 %v524_v13  ;;  %1211 = vmatpush.msrb.mxu3 %v474_v14  ;;  %v631_v13 = vld [vmem:[#allocation3 + $0x570] sm:$0xff]  ;;  %v632_v14 = vld [vmem:[#allocation3 + $0x578] sm:$0xff] }
 0x108   : > { %1510 = vmatpush.msrb.mxu2 %v537_v15  ;;  %1231 = vmatpush.msra.mxu0 %v475_v16  ;;  %v582_v15 = vld [vmem:[#allocation3 + $0x3e8] sm:$0xff]  ;;  %v645_v16 = vld [vmem:[#allocation3 + $0x5e0] sm:$0xff] }
 0x109   : > { %1251 = vmatpush.msra.mxu1 %v476_v17  ;;  %2191 = vmatmul.msk.f32.vlgmr.msrb.gmra.mxu3 %vm374_vm0, %v2680_v49  ;;  %v583_v17 = vld [vmem:[#allocation3 + $0x3f0] sm:$0xff] }
 0x10a   : > { %1511 = vmatpush.msrb.mxu2 %v489_v18  ;;  %2192 = vmatmul.msk.f32.vlgmr.msra.gmra.mxu0 %vm374_vm0, %v2680_v49  ;;  %v584_v18 = vld [vmem:[#allocation3 + $0x3f8] sm:$0xff] }
 0x10b   : > { %2193 = vmatmul.msk.f32.vlgmr.msra.gmra.mxu1 %vm374_vm0, %v2680_v49  ;;  %1286 = vmatpush.msra.mxu3 %v718_v19  ;;  %v534_v19 = vld [vmem:[#allocation3 + $0x268] sm:$0xff] }
 0x10c   : > { %1306 = vmatpush.msrb.mxu0 %v719_v20  ;;  %1326 = vmatpush.msrb.mxu1 %v720_v21  ;;  %v597_v20 = vld [vmem:[#allocation3 + $0x460] sm:$0xff]  ;;  %v535_v21 = vld [vmem:[#allocation3 + $0x270] sm:$0xff] }
 0x10d   : > { %2206 = vmatmul.msk.f32.vlgmr.msrb.gmra.mxu2 %vm374_vm0, %v2680_v49  ;;  %1287 = vmatpush.msra.mxu3 %v670_v22  ;;  %v536_v22 = vld [vmem:[#allocation3 + $0x278] sm:$0xff] }
 0x10e   : > { %1586 = vmatpush.msra.mxu2 %v733_v23  ;;  %1307 = vmatpush.msrb.mxu0 %v671_v24  ;;  %v486_v23 = vld [vmem:[#allocation3 + $0xe8] sm:$0xff]  ;;  %v549_v24 = vld [vmem:[#allocation3 + $0x2e0] sm:$0xff] }
 0x10f   : > { %1327 = vmatpush.msrb.mxu1 %v672_v25  ;;  %1288 = vmatpush.msra.mxu3 %v622_v26  ;;  %v487_v25 = vld [vmem:[#allocation3 + $0xf0] sm:$0xff]  ;;  %v488_v26 = vld [vmem:[#allocation3 + $0xf8] sm:$0xff] }
 0x110   : > { %1587 = vmatpush.msra.mxu2 %v685_v27  ;;  %1308 = vmatpush.msrb.mxu0 %v623_v28  ;;  %v501_v27 = vld [vmem:[#allocation3 + $0x160] sm:$0xff]  ;;  %v730_v28 = vld [vmem:[#allocation3 + $0x888] sm:$0xff] }
 0x111   : > { %1328 = vmatpush.msrb.mxu1 %v624_v29  ;;  %1289 = vmatpush.msra.mxu3 %v574_v30  ;;  %v731_v29 = vld [vmem:[#allocation3 + $0x890] sm:$0xff]  ;;  %v732_v30 = vld [vmem:[#allocation3 + $0x898] sm:$0xff] }
 0x112   : > { %1588 = vmatpush.msra.mxu2 %v637_v31  ;;  %1309 = vmatpush.msrb.mxu0 %v575_v32  ;;  %v682_v31 = vld [vmem:[#allocation3 + $0x708] sm:$0xff]  ;;  %v683_v32 = vld [vmem:[#allocation3 + $0x710] sm:$0xff] }
 0x113   : > { %1329 = vmatpush.msrb.mxu1 %v576_v33  ;;  %1290 = vmatpush.msra.mxu3 %v526_v34  ;;  %v684_v33 = vld [vmem:[#allocation3 + $0x718] sm:$0xff]  ;;  %v634_v34 = vld [vmem:[#allocation3 + $0x588] sm:$0xff] }
 0x114   : > { %1589 = vmatpush.msra.mxu2 %v589_v35  ;;  %1310 = vmatpush.msrb.mxu0 %v527_v36  ;;  %v635_v35 = vld [vmem:[#allocation3 + $0x590] sm:$0xff]  ;;  %v636_v36 = vld [vmem:[#allocation3 + $0x598] sm:$0xff] }
 0x115   : > { %1330 = vmatpush.msrb.mxu1 %v528_v37  ;;  %1291 = vmatpush.msra.mxu3 %v478_v38  ;;  %v586_v37 = vld [vmem:[#allocation3 + $0x408] sm:$0xff]  ;;  %v587_v38 = vld [vmem:[#allocation3 + $0x410] sm:$0xff] }
 0x116   : > { %1590 = vmatpush.msra.mxu2 %v541_v39  ;;  %1311 = vmatpush.msrb.mxu0 %v479_v40  ;;  %v588_v39 = vld [vmem:[#allocation3 + $0x418] sm:$0xff]  ;;  %v538_v40 = vld [vmem:[#allocation3 + $0x288] sm:$0xff] }
 0x117   : > { %1331 = vmatpush.msrb.mxu1 %v480_v41  ;;  %2195 = vmatmul.msk.f32.vlgmr.msra.gmra.mxu3 %vm374_vm0, %v2680_v49  ;;  %v539_v41 = vld [vmem:[#allocation3 + $0x290] sm:$0xff] }
 0x118   : > { %1591 = vmatpush.msra.mxu2 %v493_v42  ;;  %2196 = vmatmul.msk.f32.vlgmr.msrb.gmra.mxu0 %vm374_vm0, %v2680_v49  ;;  %v540_v42 = vld [vmem:[#allocation3 + $0x298] sm:$0xff] }
 0x119   : > { %2197 = vmatmul.msk.f32.vlgmr.msrb.gmra.mxu1 %vm374_vm0, %v2680_v49  ;;  %1366 = vmatpush.msrb.mxu3 %v722_v43  ;;  %v490_v43 = vld [vmem:[#allocation3 + $0x108] sm:$0xff] }
 0x11a   : > { %1386 = vmatpush.msra.mxu0 %v723_v44  ;;  %1406 = vmatpush.msra.mxu1 %v724_v45  ;;  %v491_v44 = vld [vmem:[#allocation3 + $0x110] sm:$0xff]  ;;  %v492_v45 = vld [vmem:[#allocation3 + $0x118] sm:$0xff] }
 0x11b   : > { %2210 = vmatmul.msk.f32.vlgmr.msra.gmra.mxu2 %vm374_vm0, %v2680_v49  ;;  %1367 = vmatpush.msrb.mxu3 %v674_v46  ;;  %v734_v46 = vld [vmem:[#allocation3 + $0x8a8] sm:$0xff] }
 0x11c   : > { %1666 = vmatpush.msrb.mxu2 %v737_v47  ;;  %1387 = vmatpush.msra.mxu0 %v675_v48  ;;  %v735_v47 = vld [vmem:[#allocation3 + $0x8b0] sm:$0xff]  ;;  %v736_v48 = vld [vmem:[#allocation3 + $0x8b8] sm:$0xff] }
 0x11d   : > { %1407 = vmatpush.msra.mxu1 %v676_v50  ;;  %1368 = vmatpush.msrb.mxu3 %v626_v51  ;;  %v686_v50 = vld [vmem:[#allocation3 + $0x728] sm:$0xff]  ;;  %v687_v51 = vld [vmem:[#allocation3 + $0x730] sm:$0xff] }
 0x11e   : > { %1667 = vmatpush.msrb.mxu2 %v689_v52  ;;  %1388 = vmatpush.msra.mxu0 %v627_v53  ;;  %v688_v52 = vld [vmem:[#allocation3 + $0x738] sm:$0xff]  ;;  %v638_v53 = vld [vmem:[#allocation3 + $0x5a8] sm:$0xff] }
 0x11f   : > { %1408 = vmatpush.msra.mxu1 %v628_v54  ;;  %1369 = vmatpush.msrb.mxu3 %v578_v55  ;;  %v639_v54 = vld [vmem:[#allocation3 + $0x5b0] sm:$0xff]  ;;  %v640_v55 = vld [vmem:[#allocation3 + $0x5b8] sm:$0xff] }
 0x120   : > { %1668 = vmatpush.msrb.mxu2 %v641_v56  ;;  %1389 = vmatpush.msra.mxu0 %v579_v57  ;;  %v590_v56 = vld [vmem:[#allocation3 + $0x428] sm:$0xff]  ;;  %v591_v57 = vld [vmem:[#allocation3 + $0x430] sm:$0xff] }
 0x121   : > { %1409 = vmatpush.msra.mxu1 %v580_v58  ;;  %1370 = vmatpush.msrb.mxu3 %v530_v59  ;;  %v592_v58 = vld [vmem:[#allocation3 + $0x438] sm:$0xff]  ;;  %v542_v59 = vld [vmem:[#allocation3 + $0x2a8] sm:$0xff] }
 0x122   : > { %1669 = vmatpush.msrb.mxu2 %v593_v60  ;;  %1390 = vmatpush.msra.mxu0 %v531_v61  ;;  %v543_v60 = vld [vmem:[#allocation3 + $0x2b0] sm:$0xff]  ;;  %v544_v61 = vld [vmem:[#allocation3 + $0x2b8] sm:$0xff] }
 0x123   : > { %1410 = vmatpush.msra.mxu1 %v532_v62  ;;  %1371 = vmatpush.msrb.mxu3 %v482_v63  ;;  %v494_v62 = vld [vmem:[#allocation3 + $0x128] sm:$0xff]  ;;  %v2760_v63 = vld [vmem:[#allocation6] sm:$0xff] }
 0x124   : > { %1670 = vmatpush.msrb.mxu2 %v545_v0  ;;  %1391 = vmatpush.msra.mxu0 %v483_v1  ;;  %v1893_v0 = vld [vmem:[#allocation8 + $0x78] sm:$0xff]  ;;  %v1892_v1 = vld [vmem:[#allocation8 + $0x70] sm:$0xff] }
 0x125   : > { %1411 = vmatpush.msra.mxu1 %v484_v2  ;;  %2199 = vmatmul.msk.f32.vlgmr.msrb.gmra.mxu3 %vm374_vm0, %v2680_v49  ;;  %v495_v2 = vld [vmem:[#allocation3 + $0x130] sm:$0xff] }
 0x126   : > { %1671 = vmatpush.msrb.mxu2 %v497_v3  ;;  %2200 = vmatmul.msk.f32.vlgmr.msra.gmra.mxu0 %vm374_vm0, %v2680_v49  ;;  %v496_v3 = vld [vmem:[#allocation3 + $0x138] sm:$0xff] }
 0x127   : > { %2201 = vmatmul.msk.f32.vlgmr.msra.gmra.mxu1 %vm374_vm0, %v2680_v49  ;;  %1446 = vmatpush.msra.mxu3 %v726_v4  ;;  %v759_v4 = vperm.slane %v2760_v63, 2 }
 0x128   : > { %1466 = vmatpush.msrb.mxu0 %v727_v5  ;;  %1486 = vmatpush.msrb.mxu1 %v728_v6  ;;  %v2416_v5 = vmov 0.0   ;;  %v760_v6 = vperm.slane %v2760_v63, 3 }
 0x129   : > { %2214 = vmatmul.msk.f32.vlgmr.msrb.gmra.mxu2 %vm374_vm0, %v2680_v49  ;;  %1447 = vmatpush.msra.mxu3 %v678_v7  ;;  %1816 = vst [vmem:[#allocation2] sm:$0xff] %v2416_v5  ;;  %v738_v7 = vld [vmem:[#allocation3 + $0x8c8] sm:$0xff] }
 0x12a   : > { %1746 = vmatpush.msra.mxu2 %v741_v8  ;;  %1467 = vmatpush.msrb.mxu0 %v679_v9  ;;  %1817 = vst [vmem:[#allocation2 + $0x8] sm:$0xff] %v2416_v5  ;;  %v739_v8 = vld [vmem:[#allocation3 + $0x8d0] sm:$0xff]  ;;  %v740_v9 = vld [vmem:[#allocation3 + $0x8d8] sm:$0xff] }
 0x12b   : > { %1487 = vmatpush.msrb.mxu1 %v680_v10  ;;  %1448 = vmatpush.msra.mxu3 %v630_v11  ;;  %1818 = vst [vmem:[#allocation2 + $0x10] sm:$0xff] %v2416_v5  ;;  %v690_v11 = vld [vmem:[#allocation3 + $0x748] sm:$0xff] }
 0x12c   : > { %1747 = vmatpush.msra.mxu2 %v693_v12  ;;  %1468 = vmatpush.msrb.mxu0 %v631_v13  ;;  %1819 = vst [vmem:[#allocation2 + $0x18] sm:$0xff] %v2416_v5 }
 0x12d   : > { %1488 = vmatpush.msrb.mxu1 %v632_v14  ;;  %1449 = vmatpush.msra.mxu3 %v582_v15  ;;  %1820 = vst [vmem:[#allocation2 + $0x20] sm:$0xff] %v2416_v5  ;;  %v1891_v14 = vld [vmem:[#allocation8 + $0x68] sm:$0xff]  ;;  %v691_v15 = vld [vmem:[#allocation3 + $0x750] sm:$0xff] }
 0x12e   : > { %1748 = vmatpush.msra.mxu2 %v645_v16  ;;  %1469 = vmatpush.msrb.mxu0 %v583_v17  ;;  %v692_v16 = vld [vmem:[#allocation3 + $0x758] sm:$0xff]  ;;  %1821 = vst [vmem:[#allocation2 + $0x28] sm:$0xff] %v2416_v5 }
 0x12f   : > { %1489 = vmatpush.msrb.mxu1 %v584_v18  ;;  %1450 = vmatpush.msra.mxu3 %v534_v19  ;;  %v642_v18 = vld [vmem:[#allocation3 + $0x5c8] sm:$0xff]  ;;  %v757_v19 = vperm.slane %v2760_v63, 0  ;;  %1822 = vst [vmem:[#allocation2 + $0x30] sm:$0xff] %v2416_v5  ;;  %v600_v5 = vld [vmem:[#allocation3 + $0x478] sm:$0xff] }
 0x130   : > { %1749 = vmatpush.msra.mxu2 %v597_v20  ;;  %1470 = vmatpush.msrb.mxu0 %v535_v21  ;;  %v2771_v20 = vld [vmem:[#allocation6 + $0x8] sm:$0xff]  ;;  %v1890_v21 = vld [vmem:[#allocation8 + $0x60] sm:$0xff] }
 0x131   : > { %1490 = vmatpush.msrb.mxu1 %v536_v22  ;;  %1451 = vmatpush.msra.mxu3 %v486_v23  ;;  %v643_v22 = vld [vmem:[#allocation3 + $0x5d0] sm:$0xff]  ;;  %v644_v23 = vld [vmem:[#allocation3 + $0x5d8] sm:$0xff] }
 0x132   : > { %1750 = vmatpush.msra.mxu2 %v549_v24  ;;  %1471 = vmatpush.msrb.mxu0 %v487_v25  ;;  %v594_v24 = vld [vmem:[#allocation3 + $0x448] sm:$0xff] }
 0x133   : > { %1491 = vmatpush.msrb.mxu1 %v488_v26  ;;  %2203 = vmatmul.msk.f32.vlgmr.msra.gmra.mxu3 %vm374_vm0, %v2680_v49  ;;  %v1889_v25 = vld [vmem:[#allocation8 + $0x58] sm:$0xff]  ;;  %v595_v26 = vld [vmem:[#allocation3 + $0x450] sm:$0xff] }
 0x134   : > { %1751 = vmatpush.msra.mxu2 %v501_v27  ;;  %2204 = vmatmul.msk.f32.vlgmr.msrb.gmra.mxu0 %vm374_vm0, %v2680_v49  ;;  %v596_v27 = vld [vmem:[#allocation3 + $0x458] sm:$0xff] }
 0x135   : > { %2205 = vmatmul.msk.f32.vlgmr.msrb.gmra.mxu1 %vm374_vm0, %v2680_v49  ;;  %1526 = vmatpush.msrb.mxu3 %v730_v28 }
 0x136   : > { %1546 = vmatpush.msra.mxu0 %v731_v29  ;;  %1566 = vmatpush.msra.mxu1 %v732_v30  ;;  %v769_v29 = vperm.slane %v2771_v20, 4  ;;  %v546_v30 = vld [vmem:[#allocation3 + $0x2c8] sm:$0xff] }
 0x137   : > { %2218 = vmatmul.msk.f32.vlgmr.msra.gmra.mxu2 %vm374_vm0, %v2680_v49  ;;  %1527 = vmatpush.msrb.mxu3 %v682_v31 }
 0x138   : > { %1547 = vmatpush.msra.mxu0 %v683_v32  ;;  %1567 = vmatpush.msra.mxu1 %v684_v33  ;;  %v761_v32 = vperm.slane %v2760_v63, 4  ;;  %v1888_v33 = vld [vmem:[#allocation8 + $0x50] sm:$0xff] }
 0x139   : > { %1528 = vmatpush.msrb.mxu3 %v634_v34  ;;  %1894 = vmatpush.msrb.mxu2 %v1893_v0  ;;  %v547_v34 = vld [vmem:[#allocation3 + $0x2d0] sm:$0xff]  ;;  %v648_v0 = vld [vmem:[#allocation3 + $0x5f8] sm:$0xff] }
 0x13a   : > { %1548 = vmatpush.msra.mxu0 %v635_v35  ;;  %1568 = vmatpush.msra.mxu1 %v636_v36  ;;  %v548_v35 = vld [vmem:[#allocation3 + $0x2d8] sm:$0xff]  ;;  %v498_v36 = vld [vmem:[#allocation3 + $0x148] sm:$0xff] }
 0x13b   : > { %1529 = vmatpush.msrb.mxu3 %v586_v37  ;;  %1895 = vmatpush.msrb.mxu2 %v1892_v1  ;;  %v598_v1 = vld [vmem:[#allocation3 + $0x468] sm:$0xff] }
 0x13c   : > { %1549 = vmatpush.msra.mxu0 %v587_v38  ;;  %1569 = vmatpush.msra.mxu1 %v588_v39  ;;  %v764_v38 = vperm.slane %v2760_v63, 7  ;;  %v1887_v39 = vld [vmem:[#allocation8 + $0x48] sm:$0xff] }
 0x13d   : > { %1530 = vmatpush.msrb.mxu3 %v538_v40  ;;  %1896 = vmatpush.msrb.mxu2 %v1891_v14  ;;  %v499_v40 = vld [vmem:[#allocation3 + $0x150] sm:$0xff] }
 0x13e   : > { %1550 = vmatpush.msra.mxu0 %v539_v41  ;;  %1570 = vmatpush.msra.mxu1 %v540_v42  ;;  %v500_v41 = vld [vmem:[#allocation3 + $0x158] sm:$0xff] }
 0x13f   : > { %1531 = vmatpush.msrb.mxu3 %v490_v43  ;;  %1897 = vmatpush.msrb.mxu2 %v1890_v21 }
 0x140   : > { %1551 = vmatpush.msra.mxu0 %v491_v44  ;;  %1571 = vmatpush.msra.mxu1 %v492_v45  ;;  %v742_v45 = vld [vmem:[#allocation3 + $0x8e8] sm:$0xff] }
 0x141   : > { %2207 = vmatmul.msk.f32.vlgmr.msrb.gmra.mxu3 %vm374_vm0, %v2680_v49  ;;  %2208 = vmatmul.msk.f32.vlgmr.msra.gmra.mxu0 %vm374_vm0, %v2680_v49 }
 0x142   : > { %2209 = vmatmul.msk.f32.vlgmr.msra.gmra.mxu1 %vm374_vm0, %v2680_v49  ;;  %1606 = vmatpush.msra.mxu3 %v734_v46 }
 0x143   : > { %1626 = vmatpush.msrb.mxu0 %v735_v47  ;;  %1646 = vmatpush.msrb.mxu1 %v736_v48  ;;  %v758_v47 = vperm.slane %v2760_v63, 1  ;;  %v2777_v48 = vld [vmem:[#allocation6 + $0x10] sm:$0xff] }
 0x144   : > { %1607 = vmatpush.msra.mxu3 %v686_v50  ;;  %1898 = vmatpush.msrb.mxu2 %v1889_v25  ;;  %v743_v50 = vld [vmem:[#allocation3 + $0x8f0] sm:$0xff]  ;;  %v1880_v25 = vld [vmem:[#allocation8 + $0x10] sm:$0xff] }
 0x145   : > { %1627 = vmatpush.msrb.mxu0 %v687_v51  ;;  %1647 = vmatpush.msrb.mxu1 %v688_v52  ;;  %v744_v51 = vld [vmem:[#allocation3 + $0x8f8] sm:$0xff] }
 0x146   : > { %1608 = vmatpush.msra.mxu3 %v638_v53  ;;  %1899 = vmatpush.msrb.mxu2 %v1888_v33  ;;  %v694_v53 = vld [vmem:[#allocation3 + $0x768] sm:$0xff] }
 0x147   : > { %1628 = vmatpush.msrb.mxu0 %v639_v54  ;;  %1648 = vmatpush.msrb.mxu1 %v640_v55  ;;  %v1886_v54 = vld [vmem:[#allocation8 + $0x40] sm:$0xff] }
 0x148   : > { %1609 = vmatpush.msra.mxu3 %v590_v56  ;;  %1900 = vmatpush.msrb.mxu2 %v1887_v39  ;;  %v695_v55 = vld [vmem:[#allocation3 + $0x770] sm:$0xff]  ;;  %v696_v56 = vld [vmem:[#allocation3 + $0x778] sm:$0xff] }
 0x149   : > { %1629 = vmatpush.msrb.mxu0 %v591_v57  ;;  %1649 = vmatpush.msrb.mxu1 %v592_v58  ;;  %v773_v58 = vperm.slane %v2777_v48, 0 }
 0x14a   : > { %1610 = vmatpush.msra.mxu3 %v542_v59  ;;  %v646_v59 = vld [vmem:[#allocation3 + $0x5e8] sm:$0xff]  ;;  %1901 = vmatpush.msrb.mxu2 %v1886_v54 }
 0x14b   : > { %1630 = vmatpush.msrb.mxu0 %v543_v60  ;;  %1650 = vmatpush.msrb.mxu1 %v544_v61  ;;  %v1885_v61 = vld [vmem:[#allocation8 + $0x38] sm:$0xff] }
 0x14c   : > { %1611 = vmatpush.msra.mxu3 %v494_v62  ;;  %v647_v62 = vld [vmem:[#allocation3 + $0x5f0] sm:$0xff]  ;;  %1902 = vmatpush.msrb.mxu2 %v1885_v61 }
 0x14d   : > { %1631 = vmatpush.msrb.mxu0 %v495_v2  ;;  %1651 = vmatpush.msrb.mxu1 %v496_v3  ;;  %v913_v10 = vpop.f32.mrf.mxu0  ;;  %v1884_v3 = vld [vmem:[#allocation8 + $0x30] sm:$0xff] }
 0x14e   : > { %2211 = vmatmul.msk.f32.vlgmr.msra.gmra.mxu3 %vm374_vm0, %v2680_v49  ;;  %2212 = vmatmul.msk.f32.vlgmr.msrb.gmra.mxu0 %vm374_vm0, %v2680_v49  ;;  %v914_v12 = vadd.f32 %v913_v10, %v759_v4  ;;  %v933_v13 = vpop.f32.mrf.mxu1  ;;  %v599_v4 = vld [vmem:[#allocation3 + $0x470] sm:$0xff]  ;;  %v1883_v10 = vld [vmem:[#allocation8 + $0x28] sm:$0xff] }
 0x14f   : > { %2213 = vmatmul.msk.f32.vlgmr.msrb.gmra.mxu1 %vm374_vm0, %v2680_v49  ;;  %1686 = vmatpush.msrb.mxu3 %v738_v7  ;;  %v934_v17 = vadd.f32 %v933_v13, %v760_v6  ;;  %v763_v7 = vperm.slane %v2760_v63, 6  ;;  %v502_v13 = vld [vmem:[#allocation3 + $0x168] sm:$0xff] }
 0x150   : > { %1706 = vmatpush.msra.mxu0 %v739_v8  ;;  %1726 = vmatpush.msra.mxu1 %v740_v9  ;;  %1825 = vst [vmem:[#allocation2 + $0x3] sm:$0x1] %v914_v12  ;;  %v550_v8 = vld [vmem:[#allocation3 + $0x2e8] sm:$0xff]  ;;  %v765_v9 = vperm.slane %v2771_v20, 0  ;;  %v552_v12 = vld [vmem:[#allocation3 + $0x2f8] sm:$0xff] }
 0x151   : > { %1687 = vmatpush.msrb.mxu3 %v690_v11  ;;  %1826 = vst [vmem:[#allocation2 + $0x4] sm:$0x1] %v934_v17  ;;  %v551_v11 = vld [vmem:[#allocation3 + $0x2f0] sm:$0xff]  ;;  %1903 = vmatpush.msrb.mxu2 %v1884_v3  ;;  %v504_v17 = vld [vmem:[#allocation3 + $0x178] sm:$0xff]  ;;  %v774_v3 = vperm.slane %v2777_v48, 1 }
 0x152   : > { %1707 = vmatpush.msra.mxu0 %v691_v15  ;;  %1727 = vmatpush.msra.mxu1 %v692_v16  ;;  %v1882_v15 = vld [vmem:[#allocation8 + $0x20] sm:$0xff] }
 0x153   : > { %1688 = vmatpush.msrb.mxu3 %v642_v18  ;;  %v873_v28 = vpop.f32.mrf.mxu3  ;;  %v503_v16 = vld [vmem:[#allocation3 + $0x170] sm:$0xff]  ;;  %1904 = vmatpush.msrb.mxu2 %v1883_v10 }
 0x154   : > { %1708 = vmatpush.msra.mxu0 %v643_v22  ;;  %1728 = vmatpush.msra.mxu1 %v644_v23  ;;  %v874_v31 = vadd.f32 %v873_v28, %v757_v19  ;;  %v762_v22 = vperm.slane %v2760_v63, 5  ;;  %v1881_v23 = vld [vmem:[#allocation8 + $0x18] sm:$0xff]  ;;  %v767_v28 = vperm.slane %v2771_v20, 2 }
 0x155   : > { %1689 = vmatpush.msrb.mxu3 %v594_v24  ;;  %1905 = vmatpush.msrb.mxu2 %v1882_v15  ;;  %v777_v24 = vperm.slane %v2777_v48, 4  ;;  %v780_v15 = vperm.slane %v2777_v48, 7 }
 0x156   : > { %1709 = vmatpush.msra.mxu0 %v595_v26  ;;  %1729 = vmatpush.msra.mxu1 %v596_v27  ;;  %1823 = vst [vmem:[#allocation2 + $0x1] sm:$0x1] %v874_v31  ;;  %v1113_v37 = vpop.f32.mrf.mxu2  ;;  %v768_v31 = vperm.slane %v2771_v20, 3 }
 0x157   : > { %1690 = vmatpush.msrb.mxu3 %v546_v30  ;;  %v1114_v42 = vadd.f32 %v1113_v37, %v769_v29  ;;  %v953_v43 = vpop.f32.mrf.mxu0  ;;  %1906 = vmatpush.msrb.mxu2 %v1881_v23  ;;  %v1879_v29 = vld [vmem:[#allocation8 + $0x8] sm:$0xff] }
 0x158   : > { %1710 = vmatpush.msra.mxu0 %v547_v34  ;;  %1730 = vmatpush.msra.mxu1 %v548_v35  ;;  %v954_v44 = vadd.f32 %v953_v43, %v761_v32  ;;  %v1878_v32 = vld [vmem:[#allocation8] sm:$0xff]  ;;  %v2799_v37 = vld [vmem:[#allocation6 + $0x18] sm:$0xff]  ;;  %v771_v43 = vperm.slane %v2771_v20, 6 }
 0x159   : > { %1691 = vmatpush.msrb.mxu3 %v498_v36  ;;  %1835 = vst [vmem:[#allocation2 + $0xd] sm:$0x1] %v1114_v42  ;;  %v1013_v46 = vpop.f32.mrf.mxu1  ;;  %1907 = vmatpush.msrb.mxu2 %v1880_v25  ;;  %v781_v39 = vperm.slane %v2799_v37, 0 }
 0x15a   : > { %1711 = vmatpush.msra.mxu0 %v499_v40  ;;  %1731 = vmatpush.msra.mxu1 %v500_v41  ;;  %1827 = vst [vmem:[#allocation2 + $0x5] sm:$0x1] %v954_v44  ;;  %v1014_v52 = vadd.f32 %v1013_v46, %v764_v38 }
 0x15b   : > { %2215 = vmatmul.msk.f32.vlgmr.msrb.gmra.mxu3 %vm374_vm0, %v2680_v49  ;;  %2216 = vmatmul.msk.f32.vlgmr.msra.gmra.mxu0 %vm374_vm0, %v2680_v49 }
 0x15c   : > { %2217 = vmatmul.msk.f32.vlgmr.msra.gmra.mxu1 %vm374_vm0, %v2680_v49  ;;  %1766 = vmatpush.msra.mxu3 %v742_v45  ;;  %1830 = vst [vmem:[#allocation2 + $0x8] sm:$0x1] %v1014_v52  ;;  %v893_v57 = vpop.f32.mrf.mxu3  ;;  %v772_v45 = vperm.slane %v2771_v20, 7  ;;  %v770_v52 = vperm.slane %v2771_v20, 5 }
 0x15d   : > { %1786 = vmatpush.msrb.mxu0 %v743_v50  ;;  %1806 = vmatpush.msrb.mxu1 %v744_v51  ;;  %v894_v60 = vadd.f32 %v893_v57, %v758_v47 }
 0x15e   : > { %1767 = vmatpush.msra.mxu3 %v694_v53  ;;  %1908 = vmatpush.msrb.mxu2 %v1879_v29 }
 0x15f   : > { %1787 = vmatpush.msrb.mxu0 %v695_v55  ;;  %1807 = vmatpush.msrb.mxu1 %v696_v56  ;;  %1824 = vst [vmem:[#allocation2 + $0x2] sm:$0x1] %v894_v60  ;;  %v1193_v2 = vpop.f32.mrf.mxu2  ;;  %v785_v55 = vperm.slane %v2799_v37, 4  ;;  %v776_v60 = vperm.slane %v2777_v48, 3 }
 0x160   : > { %1768 = vmatpush.msra.mxu3 %v646_v59  ;;  %v1194_v6 = vadd.f32 %v1193_v2, %v773_v58  ;;  %1909 = vmatpush.msrb.mxu2 %v1878_v32  ;;  %v2809_v58 = vstv %s2223_s28  ;;  %v775_v59 = vperm.slane %v2777_v48, 2  ;;  %v782_v32 = vperm.slane %v2799_v37, 1 }
 0x161   : > { %1788 = vmatpush.msrb.mxu0 %v647_v62  ;;  %1808 = vmatpush.msrb.mxu1 %v648_v0 }
 0x162   : > { %1769 = vmatpush.msra.mxu3 %v598_v1  ;;  %1839 = vst [vmem:[#allocation2 + $0x11] sm:$0x1] %v1194_v6 }
 0x163   : > { %1789 = vmatpush.msrb.mxu0 %v599_v4  ;;  %1809 = vmatpush.msrb.mxu1 %v600_v5  ;;  %v993_v14 = vpop.f32.mrf.mxu0  ;;  %v2821_v5 = vld [vmem:[#allocation6 + $0x20] sm:$0xff] }
 0x164   : > { %1770 = vmatpush.msra.mxu3 %v550_v8  ;;  %v994_v18 = vadd.f32 %v993_v14, %v763_v7  ;;  %v1033_v19 = vpop.f32.mrf.mxu1  ;;  %v789_v10 = vperm.slane %v2821_v5, 0  ;;  %v779_v14 = vperm.slane %v2777_v48, 6 }
 0x165   : > { %1790 = vmatpush.msrb.mxu0 %v551_v11  ;;  %1810 = vmatpush.msrb.mxu1 %v552_v12  ;;  %v1034_v21 = vadd.f32 %v1033_v19, %v765_v9 }
 0x166   : > { %1771 = vmatpush.msra.mxu3 %v502_v13  ;;  %1829 = vst [vmem:[#allocation2 + $0x7] sm:$0x1] %v994_v18 }
 0x167   : > { %1791 = vmatpush.msrb.mxu0 %v503_v16  ;;  %1811 = vmatpush.msrb.mxu1 %v504_v17  ;;  %1831 = vst [vmem:[#allocation2 + $0x9] sm:$0x1] %v1034_v21  ;;  %v778_v21 = vperm.slane %v2777_v48, 5 }
 0x168   : > { %2219 = vmatmul.msk.f32.vlgmr.msra.gmra.mxu3 %vm374_vm0, %v2680_v49  ;;  %2220 = vmatmul.msk.f32.vlgmr.msrb.gmra.mxu0 %vm374_vm0, %v2680_v49 }
 0x169   : > { %2221 = vmatmul.msk.f32.vlgmr.msrb.gmra.mxu1 %vm374_vm0, %v2680_v49  ;;  %v973_v26 = vpop.f32.mrf.mxu3  ;;  %v766_v49 = vperm.slane %v2771_v20, 1 }
 0x16a   : > { %v974_v63 = vadd.f32 %v973_v26, %v762_v22  ;;  %v1273_v27 = vpop.f32.mrf.mxu2 }
 0x16b   : > { %v1274_v30 = vadd.f32 %v1273_v27, %v777_v24  ;;  %v793_v24 = vperm.slane %v2821_v5, 4  ;;  %v784_v27 = vperm.slane %v2799_v37, 3 }
 0x16c   : > { %1828 = vst [vmem:[#allocation2 + $0x6] sm:$0x1] %v974_v63  ;;  %v783_v63 = vperm.slane %v2799_v37, 2 }
 0x16d   : > { %1843 = vst [vmem:[#allocation2 + $0x15] sm:$0x1] %v1274_v30  ;;  %v1073_v33 = vpop.f32.mrf.mxu0 }
 0x16e   : > { %v1074_v34 = vadd.f32 %v1073_v33, %v767_v28  ;;  %v1093_v35 = vpop.f32.mrf.mxu1 }
 0x16f   : > { %v1094_v36 = vadd.f32 %v1093_v35, %v768_v31 }
 0x170   : > { %1833 = vst [vmem:[#allocation2 + $0xb] sm:$0x1] %v1074_v34  ;;  %v2839_v34 = vld [vmem:[#allocation6 + $0x28] sm:$0xff] }
 0x171   : > { %1834 = vst [vmem:[#allocation2 + $0xc] sm:$0x1] %v1094_v36 }
 0x173   : > { %v1053_v38 = vpop.f32.mrf.mxu3  ;;  %v2802_v40 = vld [vmem:[#allocation2] sm:$0xff] }
 0x174   : > { %v1054_v41 = vadd.f32 %v1053_v38, %v766_v49  ;;  %1910 = vmatmul.f32.vlgmr.msrb.gmra.mxu2 %v2802_v40  ;;  %v1961_v20 = vmul.f32 %v2809_v58, %v2802_v40  ;;  %v797_v38 = vperm.slane %v2839_v34, 0 }
 0x176   : > { %1832 = vst [vmem:[#allocation2 + $0xa] sm:$0x1] %v1054_v41  ;;  %v1353_v42 = vpop.f32.mrf.mxu2  ;;  %v1976_v6 = vrot.slane %v1961_v20, 1 }
 0x177   : > { %v1354_v44 = vadd.f32 %v1353_v42, %v781_v39 }
 0x179   : > { %1847 = vst [vmem:[#allocation2 + $0x19] sm:$0x1] %v1354_v44  ;;  %v1153_v46 = vpop.f32.mrf.mxu0  ;;  %v788_v44 = vperm.slane %v2799_v37, 7 }
 0x17a   : > { %v1154_v47 = vadd.f32 %v1153_v46, %v771_v43  ;;  %v1173_v50 = vpop.f32.mrf.mxu1  ;;  %v787_v43 = vperm.slane %v2799_v37, 6 }
 0x17b   : > { %v1174_v51 = vadd.f32 %v1173_v50, %v772_v45 }
 0x17c   : > { %1837 = vst [vmem:[#allocation2 + $0xf] sm:$0x1] %v1154_v47 }
 0x17d   : > { %1838 = vst [vmem:[#allocation2 + $0x10] sm:$0x1] %v1174_v51  ;;  %v786_v51 = vperm.slane %v2799_v37, 5  ;;  %v790_v37 = vperm.slane %v2821_v5, 1 }
 0x17e   : > { %v1133_v53 = vpop.f32.mrf.mxu3 }
 0x17f   : > { %v1134_v54 = vadd.f32 %v1133_v53, %v770_v52 }
 0x181   : > { %1836 = vst [vmem:[#allocation2 + $0xe] sm:$0x1] %v1134_v54  ;;  %v801_v54 = vperm.slane %v2839_v34, 4 }
 0x182   : > { %v1433_v56 = vpop.f32.mrf.mxu2 }
 0x183   : > { %v1434_v57 = vadd.f32 %v1433_v56, %v785_v55 }
 0x185   : > { %1851 = vst [vmem:[#allocation2 + $0x1d] sm:$0x1] %v1434_v57  ;;  %v791_v57 = vperm.slane %v2821_v5, 2 }
 0x187   : > { %v1233_v61 = vpop.f32.mrf.mxu0 }
 0x188   : > { %v1234_v62 = vadd.f32 %v1233_v61, %v775_v59  ;;  %v1253_v0 = vpop.f32.mrf.mxu1  ;;  %v2815_v1 = vld [vmem:[#allocation2 + $0x8] sm:$0xff]  ;;  %v792_v59 = vperm.slane %v2821_v5, 3 }
 0x189   : > { %v1254_v2 = vadd.f32 %v1253_v0, %v776_v60  ;;  %1913 = vmatmul.f32.gmra.mxu2 %v2815_v1  ;;  %v1962_v4 = vmul.f32 %v2809_v58, %v2815_v1 }
 0x18a   : > { %1841 = vst [vmem:[#allocation2 + $0x13] sm:$0x1] %v1234_v62 }
 0x18b   : > { %1842 = vst [vmem:[#allocation2 + $0x14] sm:$0x1] %v1254_v2  ;;  %v1977_v7 = vrot.slane %v1962_v4, 1 }
 0x18c   : > { %v1213_v8 = vpop.f32.mrf.mxu3 }
 0x18d   : > { %v1214_v9 = vadd.f32 %v1213_v8, %v774_v3  ;;  %v2825_v11 = vsel %vm1975_vm1, %v1976_v6, %v1977_v7  ;;  %v795_v8 = vperm.slane %v2821_v5, 6 }
 0x18f   : > { %1840 = vst [vmem:[#allocation2 + $0x12] sm:$0x1] %v1214_v9  ;;  %v796_v9 = vperm.slane %v2821_v5, 7 }
 0x190   : > { %v1513_v12 = vpop.f32.mrf.mxu2 }
 0x191   : > { %v1514_v13 = vadd.f32 %v1513_v12, %v789_v10 }
 0x193   : > { %1855 = vst [vmem:[#allocation2 + $0x21] sm:$0x1] %v1514_v13 }
 0x195   : > { %v1313_v16 = vpop.f32.mrf.mxu0 }
 0x196   : > { %v1314_v17 = vadd.f32 %v1313_v16, %v779_v14  ;;  %v1333_v18 = vpop.f32.mrf.mxu1 }
 0x197   : > { %v1334_v19 = vadd.f32 %v1333_v18, %v780_v15  ;;  %v794_v15 = vperm.slane %v2821_v5, 5  ;;  %v799_v18 = vperm.slane %v2839_v34, 2 }
 0x198   : > { %1845 = vst [vmem:[#allocation2 + $0x17] sm:$0x1] %v1314_v17 }
 0x199   : > { %1846 = vst [vmem:[#allocation2 + $0x18] sm:$0x1] %v1334_v19  ;;  %v800_v19 = vperm.slane %v2839_v34, 3 }
 0x19a   : > { %v1293_v22 = vpop.f32.mrf.mxu3 }
 0x19b   : > { %v1294_v23 = vadd.f32 %v1293_v22, %v778_v21 }
 0x19d   : > { %1844 = vst [vmem:[#allocation2 + $0x16] sm:$0x1] %v1294_v23 }
 0x19e   : > { %v1593_v25 = vpop.f32.mrf.mxu2 }
 0x19f   : > { %v1594_v26 = vadd.f32 %v1593_v25, %v793_v24  ;;  %v798_v25 = vperm.slane %v2839_v34, 1 }
 0x1a1   : > { %1859 = vst [vmem:[#allocation2 + $0x25] sm:$0x1] %v1594_v26 }
 0x1a3   : > { %v1393_v28 = vpop.f32.mrf.mxu0 }
 0x1a4   : > { %v1394_v29 = vadd.f32 %v1393_v28, %v783_v63  ;;  %v1413_v30 = vpop.f32.mrf.mxu1  ;;  %v2833_v31 = vld [vmem:[#allocation2 + $0x10] sm:$0xff] }
 0x1a5   : > { %v1414_v48 = vadd.f32 %v1413_v30, %v784_v27  ;;  %1916 = vmatmul.f32.gmra.mxu2 %v2833_v31  ;;  %v1963_v33 = vmul.f32 %v2809_v58, %v2833_v31  ;;  %v803_v30 = vperm.slane %v2839_v34, 6 }
 0x1a6   : > { %1849 = vst [vmem:[#allocation2 + $0x1b] sm:$0x1] %v1394_v29 }
 0x1a7   : > { %1850 = vst [vmem:[#allocation2 + $0x1c] sm:$0x1] %v1414_v48  ;;  %v1979_v35 = vrot.slane %v1963_v33, 1  ;;  %v804_v48 = vperm.slane %v2839_v34, 7 }
 0x1a8   : > { %v1373_v36 = vpop.f32.mrf.mxu3 }
 0x1a9   : > { %v1374_v49 = vadd.f32 %v1373_v36, %v782_v32  ;;  %v2843_v39 = vsel %vm1975_vm1, %v1977_v7, %v1979_v35 }
 0x1ab   : > { %1848 = vst [vmem:[#allocation2 + $0x1a] sm:$0x1] %v1374_v49  ;;  %v802_v49 = vperm.slane %v2839_v34, 5 }
 0x1ac   : > { %v1673_v41 = vpop.f32.mrf.mxu2 }
 0x1ad   : > { %v1674_v42 = vadd.f32 %v1673_v41, %v797_v38 }
 0x1af   : > { %1863 = vst [vmem:[#allocation2 + $0x29] sm:$0x1] %v1674_v42 }
 0x1b1   : > { %v1473_v45 = vpop.f32.mrf.mxu0 }
 0x1b2   : > { %v1474_v46 = vadd.f32 %v1473_v45, %v787_v43  ;;  %v1493_v47 = vpop.f32.mrf.mxu1 }
 0x1b3   : > { %v1494_v50 = vadd.f32 %v1493_v47, %v788_v44  ;;  %v2883_v44 = vstv %s1932_s29 }
 0x1b4   : > { %1853 = vst [vmem:[#allocation2 + $0x1f] sm:$0x1] %v1474_v46  ;;  %v2887_v46 = vstv %s2222_s30 }
 0x1b5   : > { %1854 = vst [vmem:[#allocation2 + $0x20] sm:$0x1] %v1494_v50 }
 0x1b6   : > { %v1453_v52 = vpop.f32.mrf.mxu3 }
 0x1b7   : > { %v1454_v53 = vadd.f32 %v1453_v52, %v786_v51  ;;  %v1938_v52 = vmul.f32 %v2883_v44, %v2802_v40 }
 0x1b9   : > { %1852 = vst [vmem:[#allocation2 + $0x1e] sm:$0x1] %v1454_v53 }
 0x1ba   : > { %v1753_v55 = vpop.f32.mrf.mxu2 }
 0x1bb   : > { %v1754_v56 = vadd.f32 %v1753_v55, %v801_v54 }
 0x1bd   : > { %1867 = vst [vmem:[#allocation2 + $0x2d] sm:$0x1] %v1754_v56 }
 0x1be   : > { %v1553_v60 = vpop.f32.mrf.mxu0 }
 0x1bf   : > { %v1554_v20 = vadd.f32 %v1553_v60, %v791_v57  ;;  %v1573_v61 = vpop.f32.mrf.mxu1  ;;  %v1939_v60 = vmul.f32 %v2883_v44, %v2815_v1 }
 0x1c0   : > { %v1574_v62 = vadd.f32 %v1573_v61, %v792_v59  ;;  %v2851_v0 = vld [vmem:[#allocation2 + $0x18] sm:$0xff] }
 0x1c1   : > { %1857 = vst [vmem:[#allocation2 + $0x23] sm:$0x1] %v1554_v20  ;;  %1919 = vmatmul.f32.gmra.mxu2 %v2851_v0  ;;  %v1964_v2 = vmul.f32 %v2809_v58, %v2851_v0 }
 0x1c2   : > { %1858 = vst [vmem:[#allocation2 + $0x24] sm:$0x1] %v1574_v62 }
 0x1c3   : > { %v1981_v3 = vrot.slane %v1964_v2, 1 }
 0x1c4   : > { %v1533_v4 = vpop.f32.mrf.mxu3 }
 0x1c5   : > { %v1534_v6 = vadd.f32 %v1533_v4, %v790_v37  ;;  %v2858_v7 = vsel %vm1975_vm1, %v1979_v35, %v1981_v3  ;;  %v2045_v4 = vstv %s2225_s8 }
 0x1c7   : > { %1856 = vst [vmem:[#allocation2 + $0x22] sm:$0x1] %v1534_v6 }
 0x1cb   : > { %v1633_v10 = vpop.f32.mrf.mxu0 }
 0x1cc   : > { %v1634_v12 = vadd.f32 %v1633_v10, %v795_v8  ;;  %v1653_v13 = vpop.f32.mrf.mxu1 }
 0x1cd   : > { %v1654_v14 = vadd.f32 %v1653_v13, %v796_v9  ;;  %v1940_v9 = vmul.f32 %v2883_v44, %v2833_v31 }
 0x1ce   : > { %1861 = vst [vmem:[#allocation2 + $0x27] sm:$0x1] %v1634_v12 }
 0x1cf   : > { %1862 = vst [vmem:[#allocation2 + $0x28] sm:$0x1] %v1654_v14 }
 0x1d1   : > { %v1613_v16 = vpop.f32.mrf.mxu3 }
 0x1d2   : > { %v1614_v17 = vadd.f32 %v1613_v16, %v794_v15 }
 0x1d4   : > { %1860 = vst [vmem:[#allocation2 + $0x26] sm:$0x1] %v1614_v17 }
 0x1d8   : > { %v1713_v21 = vpop.f32.mrf.mxu0 }
 0x1d9   : > { %v1714_v22 = vadd.f32 %v1713_v21, %v799_v18  ;;  %v1733_v23 = vpop.f32.mrf.mxu1 }
 0x1da   : > { %v1734_v24 = vadd.f32 %v1733_v23, %v800_v19  ;;  %v1941_v19 = vmul.f32 %v2883_v44, %v2851_v0 }
 0x1db   : > { %1865 = vst [vmem:[#allocation2 + $0x2b] sm:$0x1] %v1714_v22  ;;  %v2866_v26 = vld [vmem:[#allocation2 + $0x20] sm:$0xff] }
 0x1dc   : > { %1866 = vst [vmem:[#allocation2 + $0x2c] sm:$0x1] %v1734_v24  ;;  %1922 = vmatmul.f32.gmra.mxu2 %v2866_v26  ;;  %v1965_v5 = vmul.f32 %v2809_v58, %v2866_v26 }
 0x1de   : > { %v1693_v63 = vpop.f32.mrf.mxu3  ;;  %v1983_v27 = vrot.slane %v1965_v5, 1 }
 0x1df   : > { %v1694_v28 = vadd.f32 %v1693_v63, %v798_v25 }
 0x1e0   : > { %v2872_v29 = vsel %vm1975_vm1, %v1981_v3, %v1983_v27 }
 0x1e1   : > { %1864 = vst [vmem:[#allocation2 + $0x2a] sm:$0x1] %v1694_v28 }
 0x1e5   : > { %v1793_v32 = vpop.f32.mrf.mxu0 }
 0x1e6   : > { %v1794_v33 = vadd.f32 %v1793_v32, %v803_v30  ;;  %v1813_v35 = vpop.f32.mrf.mxu1 }
 0x1e7   : > { %v1814_v36 = vadd.f32 %v1813_v35, %v804_v48 }
 0x1e8   : > { %1869 = vst [vmem:[#allocation2 + $0x2f] sm:$0x1] %v1794_v33 }
 0x1e9   : > { %1870 = vst [vmem:[#allocation2 + $0x30] sm:$0x1] %v1814_v36 }
 0x1eb   : > { %v1773_v38 = vpop.f32.mrf.mxu3 }
 0x1ec   : > { %v1774_v41 = vadd.f32 %v1773_v38, %v802_v49 }
 0x1ee   : > { %1868 = vst [vmem:[#allocation2 + $0x2e] sm:$0x1] %v1774_v41 }
 0x1f0   : > { %v2877_v42 = vld [vmem:[#allocation2 + $0x30] sm:$0xff] }
 0x1f1   : > { %v2881_v43 = vmul.f32 %v2809_v58, %v2877_v42 }
 0x1f3   : > { %v1987_v51 = vrot.slane %v2881_v43, 1 }
 0x1f5   : > { %v2885_v45 = vld [vmem:[#allocation2 + $0x28] sm:$0xff] }
 0x1f6   : > { %1925 = vmatmul.f32.gmra.mxu2 %v2885_v45  ;;  %v1966_v34 = vmul.f32 %v2809_v58, %v2885_v45  ;;  %v2902_v58 = vstv %s2224_s7  ;;  %v1943_v49 = vmul.f32 %v2883_v44, %v2885_v45 }
 0x1f7   : > { %v1911_v47 = vpop.f32.mrf.mxu2 }
 0x1f8   : > { %v1985_v50 = vrot.slane %v1966_v34, 1  ;;  %v1946_v53 = vmul.f32 %v2887_v46, %v1911_v47  ;;  %v2004_v59 = vmul.f32 %v2902_v58, %v1911_v47 }
 0x1fa   : > { %v1953_v54 = vadd.f32 %v1946_v53, %v1938_v52  ;;  %v1986_v55 = vsel %vm1975_vm1, %v1983_v27, %v1985_v50  ;;  %v1988_v56 = vsel %vm1975_vm1, %v1985_v50, %v1987_v51  ;;  %v2018_v62 = vrot.slane %v2004_v59, 1 }
 0x1fb   : > { %v1942_v27 = vmul.f32 %v2883_v44, %v2866_v26 }
 0x1fc   : > { %v1996_v57 = vadd.f32 %v2825_v11, %v1953_v54 }
 0x1fe   : > { %1928 = vmatmul.f32.gmra.mxu2 %v2877_v42 }
 0x20c   : > { %v1914_v40 = vpop.f32.mrf.mxu2 }
 0x20d   : > { %v1947_v20 = vmul.f32 %v2887_v46, %v1914_v40  ;;  %v2005_v61 = vmul.f32 %v2902_v58, %v1914_v40 }
 0x20f   : > { %v1954_v37 = vadd.f32 %v1947_v20, %v1939_v60  ;;  %v2019_v11 = vrot.slane %v2005_v61, 1 }
 0x211   : > { %v1997_v2 = vadd.f32 %v2843_v39, %v1954_v37  ;;  %v2020_v3 = vsel %vm1975_vm1, %v2018_v62, %v2019_v11 }
 0x212   : > { %v2038_v6 = vadd.f32 %v2020_v3, %v1996_v57 }
 0x214   : > { %v2046_v1 = vadd.f32 %v2045_v4, %v2038_v6 }
 0x216   : > { %2053 = vst [vmem:[%s2915_s12] sm:$0xff] %v2046_v1 }
 0x228   : > { %v1917_v8 = vpop.f32.mrf.mxu2 }
 0x229   : > { %v1948_v10 = vmul.f32 %v2887_v46, %v1917_v8  ;;  %v2006_v39 = vmul.f32 %v2902_v58, %v1917_v8 }
 0x22b   : > { %v1955_v12 = vadd.f32 %v1948_v10, %v1940_v9  ;;  %v2021_v13 = vrot.slane %v2006_v39, 1 }
 0x22d   : > { %v1998_v14 = vadd.f32 %v2858_v7, %v1955_v12  ;;  %v2022_v15 = vsel %vm1975_vm1, %v2019_v11, %v2021_v13 }
 0x22e   : > { %v2039_v16 = vadd.f32 %v2022_v15, %v1997_v2 }
 0x230   : > { %v2047_v17 = vadd.f32 %v2045_v4, %v2039_v16 }
 0x232   : > { %2054 = vst [vmem:[%s2915_s12 + $0x8] sm:$0xff] %v2047_v17 }
 0x244   : > { %v1920_v18 = vpop.f32.mrf.mxu2 }
 0x245   : > { %v1949_v31 = vmul.f32 %v2887_v46, %v1920_v18  ;;  %v2007_v21 = vmul.f32 %v2902_v58, %v1920_v18 }
 0x247   : > { %v1956_v22 = vadd.f32 %v1949_v31, %v1941_v19  ;;  %v2023_v23 = vrot.slane %v2007_v21, 1 }
 0x249   : > { %v1999_v24 = vadd.f32 %v2872_v29, %v1956_v22  ;;  %v2024_v7 = vsel %vm1975_vm1, %v2021_v13, %v2023_v23 }
 0x24a   : > { %v2040_v25 = vadd.f32 %v2024_v7, %v1998_v14 }
 0x24c   : > { %v2048_v5 = vadd.f32 %v2045_v4, %v2040_v25 }
 0x24e   : > { %2055 = vst [vmem:[%s2915_s12 + $0x10] sm:$0xff] %v2048_v5 }
 0x25f   : > { %v1923_v63 = vpop.f32.mrf.mxu2 }
 0x260   : > { %v1950_v0 = vmul.f32 %v2887_v46, %v1923_v63  ;;  %v2008_v28 = vmul.f32 %v2902_v58, %v1923_v63 }
 0x262   : > { %v1957_v30 = vadd.f32 %v1950_v0, %v1942_v27  ;;  %v2025_v48 = vrot.slane %v2008_v28, 1 }
 0x264   : > { %v2000_v32 = vadd.f32 %v1986_v55, %v1957_v30  ;;  %v2026_v33 = vsel %vm1975_vm1, %v2023_v23, %v2025_v48  ;;  %v1944_v55 = vmul.f32 %v2883_v44, %v2877_v42 }
 0x265   : > { %v2041_v35 = vadd.f32 %v2026_v33, %v1999_v24 }
 0x267   : > { %v2049_v29 = vadd.f32 %v2045_v4, %v2041_v35 }
 0x269   : > { %2056 = vst [vmem:[%s2915_s12 + $0x18] sm:$0xff] %v2049_v29 }
 0x279   : > { %v1926_v36 = vpop.f32.mrf.mxu2 }
 0x27a   : > { %v1951_v38 = vmul.f32 %v2887_v46, %v1926_v36  ;;  %v2009_v26 = vmul.f32 %v2902_v58, %v1926_v36 }
 0x27c   : > { %v1958_v41 = vadd.f32 %v1951_v38, %v1943_v49  ;;  %v2027_v34 = vrot.slane %v2009_v26, 1 }
 0x27e   : > { %v2001_v47 = vadd.f32 %v1988_v56, %v1958_v41  ;;  %v2028_v50 = vsel %vm1975_vm1, %v2025_v48, %v2027_v34 }
 0x27f   : > { %v2042_v52 = vadd.f32 %v2028_v50, %v2000_v32 }
 0x281   : > { %v2050_v53 = vadd.f32 %v2045_v4, %v2042_v52  ;;  %v1929_v54 = vpop.f32.mrf.mxu2 }
 0x282   : > { %v1952_v57 = vmul.f32 %v2887_v46, %v1929_v54  ;;  %v2010_v45 = vmul.f32 %v2902_v58, %v1929_v54 }
 0x283   : > { %2057 = vst [vmem:[%s2915_s12 + $0x20] sm:$0xff] %v2050_v53 }
 0x284   : > { %v1959_v59 = vadd.f32 %v1952_v57, %v1944_v55  ;;  %v2029_v40 = vrot.slane %v2010_v45, 1 }
 0x286   : > { %v2002_v56 = vadd.f32 %v1987_v51, %v1959_v59  ;;  %v2030_v60 = vsel %vm1975_vm1, %v2027_v34, %v2029_v40 }
 0x287   : > { %v2043_v20 = vadd.f32 %v2030_v60, %v2001_v47 }
 0x288   : > { %v2044_v61 = vadd.f32 %v2029_v40, %v2002_v56 }
 0x289   : > { %v2051_v62 = vadd.f32 %v2045_v4, %v2043_v20 }
 0x28a   : > { %v2052_v37 = vadd.f32 %v2045_v4, %v2044_v61 }
 0x28b   : > { %2058 = vst [vmem:[%s2915_s12 + $0x28] sm:$0xff] %v2051_v62 }
 0x28c   : > { %2059 = vst [vmem:[%s2915_s12 + $0x30] sm:$0x1] %v2052_v37 }
 0x28d PF: > { %s19_s21 = sadd.s32 1, %s2406_s21  }
 0x28e   : > { %p16_p7 = scmp.ge.s32.totalorder %s19_s21, 6  }
 0x290   :  { %18 = sbr.rel (!%p16_p7) target bundleno = 3 (0x3), region = 92 }
 0x295   :  { %2081 = vsyncpa [#allocation4], 1 }
 0x296   :  { %2083 = vsyncpa [#allocation4 + $0x1], 1 }
 0x297   :  { %2084 = vsyncpa [#allocation7], 1 }
 0x298   :  { %2085 = vsyncpa [#allocation5], 1 }
 0x299   :  { %2087 = vsyncpa [#allocation5 + $0x1], 1 }

</bundles_post_ra>
